<compile_context>
chip_gen: v6e
topology: v6e:2x2x1
jax: 0.10.0
libtpu: 0.0.40
codegen_flags: <defaults>
</compile_context>

<pallas_src>
import jax
import jax.numpy as jnp
import numpy as np
from jax import lax
from jax.experimental import pallas as pl
from jax.experimental.pallas import tpu as pltpu


def _conv3x3_im2col_kernel(xm_ref, h0_ref, h1_ref, w_ref, b_ref, o_ref,
                           xt_ref, col_ref):
    # xm_ref:  (1, TH, Wp, Cin)   main rows of the zero-padded input tile
    # h0_ref:  (1, 1, Wp, Cin)    halo row (t+1)*TH     (padded row coords)
    # h1_ref:  (1, 1, Wp, Cin)    halo row (t+1)*TH + 1
    # w_ref:   (9*Cin, Cout)      im2col weights, K ordering = (kh, kw, cin)
    # b_ref:   (1, Cout)          bias (f32)
    # o_ref:   (1, TH, W, Cout)   conv output tile (NHWC, lane-dense in Cout)
    # xt_ref:  (TH+2, Wp, Cin)    VMEM scratch: haloed input tile
    # col_ref: (TH, W, 9*Cin)     VMEM scratch: im2col activations
    TH, Wp, Cin = xm_ref.shape[1], xm_ref.shape[2], xm_ref.shape[3]
    W, Cout = o_ref.shape[2], o_ref.shape[3]
    K = w_ref.shape[0]  # 9 * Cin

    # Assemble the (TH+2)-row haloed tile once in VMEM.
    xt_ref[0:TH] = xm_ref[0]
    xt_ref[TH:TH + 1] = h0_ref[0]
    xt_ref[TH + 1:TH + 2] = h1_ref[0]

    # im2col: 9 shifted windows -> channel index (kh*3 + kw)*Cin + cin.
    for kh in range(3):
        for kw in range(3):
            tap = kh * 3 + kw
            col_ref[:, :, tap * Cin:(tap + 1) * Cin] = (
                xt_ref[kh:kh + TH, kw:kw + W, :])

    # Single MXU matmul per tile: (TH*W, 9*Cin) @ (9*Cin, Cout), f32 accumulation.
    patches = col_ref[...].reshape(TH * W, K)
    acc = jnp.dot(patches, w_ref[...], preferred_element_type=jnp.float32)
    acc = acc + b_ref[...]                       # (1, Cout) broadcast, f32 epilogue
    o_ref[0] = acc.reshape(TH, W, Cout).astype(o_ref.dtype)


def _pick_tile_h(H, W, cin, cout, act_bytes, out_bytes,
                 budget_bytes=8 * 1024 * 1024):
    """Largest divisor of H whose per-step working set fits the VMEM budget."""
    wp = W + 2
    lanes_col = max(9 * cin, 128)  # im2col scratch is lane-padded to >= 128
    best = 1
    for th in range(1, H + 1):
        if H % th:
            continue
        need = (2 * (th + 2) * wp * cin * act_bytes   # input blocks (double-buffered)
                + 2 * th * W * cout * out_bytes       # output block (double-buffered)
                + (th + 2) * wp * cin * act_bytes     # haloed-tile scratch
                + th * W * lanes_col * act_bytes      # im2col scratch
                + th * W * cout * 4)                  # f32 accumulator value
        if need <= budget_bytes:
            best = th
    return best


def upsample_forward(x_nchw, w_hwio, bias, r, *, tile_h=None, compute_dtype=None):
    """EDSR UpSample forward: Conv2d(C, r^2*C, 3, padding=1) + PixelShuffle(r).

    x_nchw: (B, C, H, W); w_hwio: (3, 3, C, r^2*C); bias: (r^2*C,). Returns NCHW.
    compute_dtype: dtype of the matmul inputs (e.g. jnp.bfloat16 on v6e/v7x);
    accumulation and bias add stay in f32, output keeps x's dtype.
    """
    B, Cin, H, W = x_nchw.shape
    kh_, kw_, wcin, Cout = w_hwio.shape
    assert (kh_, kw_) == (3, 3) and wcin == Cin and Cout == r * r * Cin

    cd = x_nchw.dtype if compute_dtype is None else np.dtype(compute_dtype)

    # One layout pass over the (small) input: NCHW -> NHWC, zero pad H/W by 1, cast.
    x_nhwc = jnp.transpose(x_nchw, (0, 2, 3, 1))
    xp = jnp.pad(x_nhwc, ((0, 0), (1, 1), (1, 1), (0, 0))).astype(cd)
    Wp = W + 2

    w_flat = w_hwio.reshape(9 * Cin, Cout).astype(cd)   # K ordering (kh, kw, cin)
    b2 = bias.reshape(1, Cout).astype(jnp.float32)

    if tile_h is None:
        tile_h = _pick_tile_h(H, W, Cin, Cout, cd.itemsize, x_nchw.dtype.itemsize)
    TH = int(tile_h)
    assert H % TH == 0, f"tile_h={TH} must divide H={H}"
    T = H // TH

    flops = 2 * B * H * W * 9 * Cin * Cout
    bytes_accessed = (xp.size * xp.dtype.itemsize
                      + w_flat.size * w_flat.dtype.itemsize
                      + b2.size * b2.dtype.itemsize
                      + B * H * W * Cout * x_nchw.dtype.itemsize)

    conv_nhwc = pl.pallas_call(
        _conv3x3_im2col_kernel,
        out_shape=jax.ShapeDtypeStruct((B, H, W, Cout), x_nchw.dtype),
        grid_spec=pltpu.PrefetchScalarGridSpec(
            num_scalar_prefetch=0,
            grid=(B, T),
            in_specs=[
                # main TH rows of the tile: padded rows [t*TH, t*TH + TH)
                pl.BlockSpec((1, TH, Wp, Cin), lambda b, t: (b, t, 0, 0)),
                # two 1-row halo fetches from the same padded array
                pl.BlockSpec((1, 1, Wp, Cin), lambda b, t: (b, (t + 1) * TH, 0, 0)),
                pl.BlockSpec((1, 1, Wp, Cin), lambda b, t: (b, (t + 1) * TH + 1, 0, 0)),
                pl.BlockSpec((9 * Cin, Cout), lambda b, t: (0, 0)),
                pl.BlockSpec((1, Cout), lambda b, t: (0, 0)),
            ],
            out_specs=pl.BlockSpec((1, TH, W, Cout), lambda b, t: (b, t, 0, 0)),
            scratch_shapes=[
                pltpu.VMEM((TH + 2, Wp, Cin), cd),   # haloed input tile
                pltpu.VMEM((TH, W, 9 * Cin), cd),    # im2col activations
            ],
        ),
        compiler_params=pltpu.CompilerParams(
            dimension_semantics=("parallel", "parallel")),
        cost_estimate=pl.CostEstimate(flops=flops, transcendentals=0,
                                      bytes_accessed=bytes_accessed),
    )(xp, xp, xp, w_flat, b2)

    # PixelShuffle in NHWC (pure layout), then a single NHWC->NCHW transpose.
    y = conv_nhwc.reshape(B, H, W, Cin, r, r)
    y = jnp.transpose(y, (0, 1, 4, 2, 5, 3))     # (B, H, r, W, r, C)
    y = y.reshape(B, H * r, W * r, Cin)
    return jnp.transpose(y, (0, 3, 1, 2))        # (B, C, H*r, W*r)


if __name__ == "__main__":
    B, C, H, W = 2, 4, 16, 16
    r = 2
    Cout = r * r * C

    key = jax.random.PRNGKey(0)
    kx, kw, kb = jax.random.split(key, 3)
    x = jax.random.normal(kx, (B, C, H, W), dtype=jnp.float32)
    # Deterministic synthetic parameters, shapes match nn.Conv2d(C, r^2*C, 3, padding=1) (HWIO).
    w = jax.random.normal(kw, (3, 3, C, Cout), dtype=jnp.float32) * 0.1
    b = jax.random.normal(kb, (Cout,), dtype=jnp.float32) * 0.1

    def reference(x_, w_, b_):
        conv = lax.conv_general_dilated(
            x_, w_, window_strides=(1, 1), padding="SAME",
            dimension_numbers=("NCHW", "HWIO", "NCHW"))
        conv = conv + b_[None, :, None, None]
        Bb, Crr, Hh, Ww = conv.shape
        Cc = Crr // (r * r)
        y = conv.reshape(Bb, Cc, r, r, Hh, Ww)
        y = jnp.transpose(y, (0, 1, 4, 2, 5, 3))
        return y.reshape(Bb, Cc, Hh * r, Ww * r)

    # f32 path with an explicit small H-tile so the halo path is exercised (grid = (2, 2)).
    out = jax.block_until_ready(upsample_forward(x, w, b, r, tile_h=8))
    assert out.shape == (B, C, H * r, W * r), out.shape
    ref = reference(x, w, b)
    err = float(jnp.max(jnp.abs(out - ref)))
    assert err < 1e-3, f"f32 path max abs err {err}"

    # bf16 matmul inputs (f32 accumulation) - the v6e/v7x fast path; auto tile size.
    out_bf = jax.block_until_ready(
        upsample_forward(x, w, b, r, compute_dtype=jnp.bfloat16))
    ref_bf = reference(x.astype(jnp.bfloat16).astype(jnp.float32),
                       w.astype(jnp.bfloat16).astype(jnp.float32), b)
    err_bf = float(jnp.max(jnp.abs(out_bf - ref_bf)))
    assert err_bf < 3e-2, f"bf16 path max abs err {err_bf}"

    print("KERNEL_OK")
</pallas_src>

<mosaic_0001>
module attributes {stable_mosaic.version = 11 : i64} {
  func.func @_conv3x3_im2col_kernel(%arg0: i32, %arg1: i32, %arg2: memref<1x8x18x4xf32, #tpu.memory_space<vmem>>, %arg3: memref<1x1x18x4xf32, #tpu.memory_space<vmem>>, %arg4: memref<1x1x18x4xf32, #tpu.memory_space<vmem>>, %arg5: memref<36x16xf32, #tpu.memory_space<vmem>>, %arg6: memref<1x16xf32, #tpu.memory_space<vmem>>, %arg7: memref<1x8x16x16xf32, #tpu.memory_space<vmem>>, %arg8: memref<10x18x4xf32, #tpu.memory_space<vmem>>, %arg9: memref<8x16x36xf32, #tpu.memory_space<vmem>>) attributes {dimension_semantics = [#tpu.dimension_semantics<parallel>, #tpu.dimension_semantics<parallel>], iteration_bounds = array<i64: 2, 2>, scalar_prefetch = 0 : i64, scratch_operands = 2 : i64, tpu.core_type = #tpu.core_type<tc>, window_params = [{transform_indices = @transform_0, window_bounds = array<i64: 1, 8, 18, 4>}, {transform_indices = @transform_1, window_bounds = array<i64: 1, 1, 18, 4>}, {transform_indices = @transform_2, window_bounds = array<i64: 1, 1, 18, 4>}, {pipeline_mode = #tpu.pipeline_mode<synchronous>, transform_indices = @transform_3, window_bounds = array<i64: 36, 16>}, {pipeline_mode = #tpu.pipeline_mode<synchronous>, transform_indices = @transform_4, window_bounds = array<i64: 1, 16>}, {transform_indices = @transform_5, window_bounds = array<i64: 1, 8, 16, 16>}]} {
    %c0 = arith.constant 0 : index
    %c0_0 = arith.constant 0 : index
    %c0_1 = arith.constant 0 : index
    %c0_2 = arith.constant 0 : index
    %0 = vector.load %arg2[%c0, %c0_0, %c0_1, %c0_2] : memref<1x8x18x4xf32, #tpu.memory_space<vmem>>, vector<1x8x18x4xf32>
    %1 = vector.shape_cast %0 : vector<1x8x18x4xf32> to vector<8x18x4xf32>
    %c0_3 = arith.constant 0 : index
    %c0_4 = arith.constant 0 : index
    %c0_5 = arith.constant 0 : index
    %2 = vector.load %arg8[%c0_3, %c0_4, %c0_5] : memref<10x18x4xf32, #tpu.memory_space<vmem>>, vector<8x18x4xf32>
    tpu.vector_store %arg8[%c0_3, %c0_4, %c0_5], %1 {strides = array<i32>} : memref<10x18x4xf32, #tpu.memory_space<vmem>>, vector<8x18x4xf32>,
    %c0_6 = arith.constant 0 : index
    %c0_7 = arith.constant 0 : index
    %c0_8 = arith.constant 0 : index
    %c0_9 = arith.constant 0 : index
    %3 = vector.load %arg3[%c0_6, %c0_7, %c0_8, %c0_9] : memref<1x1x18x4xf32, #tpu.memory_space<vmem>>, vector<1x1x18x4xf32>
    %4 = vector.shape_cast %3 : vector<1x1x18x4xf32> to vector<1x18x4xf32>
    %c8 = arith.constant 8 : index
    %c0_10 = arith.constant 0 : index
    %c0_11 = arith.constant 0 : index
    %5 = vector.load %arg8[%c8, %c0_10, %c0_11] : memref<10x18x4xf32, #tpu.memory_space<vmem>>, vector<1x18x4xf32>
    tpu.vector_store %arg8[%c8, %c0_10, %c0_11], %4 {strides = array<i32>} : memref<10x18x4xf32, #tpu.memory_space<vmem>>, vector<1x18x4xf32>,
    %c0_12 = arith.constant 0 : index
    %c0_13 = arith.constant 0 : index
    %c0_14 = arith.constant 0 : index
    %c0_15 = arith.constant 0 : index
    %6 = vector.load %arg4[%c0_12, %c0_13, %c0_14, %c0_15] : memref<1x1x18x4xf32, #tpu.memory_space<vmem>>, vector<1x1x18x4xf32>
    %7 = vector.shape_cast %6 : vector<1x1x18x4xf32> to vector<1x18x4xf32>
    %c9 = arith.constant 9 : index
    %c0_16 = arith.constant 0 : index
    %c0_17 = arith.constant 0 : index
    %8 = vector.load %arg8[%c9, %c0_16, %c0_17] : memref<10x18x4xf32, #tpu.memory_space<vmem>>, vector<1x18x4xf32>
    tpu.vector_store %arg8[%c9, %c0_16, %c0_17], %7 {strides = array<i32>} : memref<10x18x4xf32, #tpu.memory_space<vmem>>, vector<1x18x4xf32>,
    %c0_18 = arith.constant 0 : index
    %c0_19 = arith.constant 0 : index
    %c0_20 = arith.constant 0 : index
    %9 = vector.load %arg8[%c0_18, %c0_19, %c0_20] : memref<10x18x4xf32, #tpu.memory_space<vmem>>, vector<8x16x4xf32>
    %c0_21 = arith.constant 0 : index
    %c0_22 = arith.constant 0 : index
    %c0_23 = arith.constant 0 : index
    %10 = vector.load %arg9[%c0_21, %c0_22, %c0_23] : memref<8x16x36xf32, #tpu.memory_space<vmem>>, vector<8x16x4xf32>
    tpu.vector_store %arg9[%c0_21, %c0_22, %c0_23], %9 {strides = array<i32>} : memref<8x16x36xf32, #tpu.memory_space<vmem>>, vector<8x16x4xf32>,
    %c0_24 = arith.constant 0 : index
    %c1 = arith.constant 1 : index
    %c0_25 = arith.constant 0 : index
    %11 = vector.load %arg8[%c0_24, %c1, %c0_25] : memref<10x18x4xf32, #tpu.memory_space<vmem>>, vector<8x16x4xf32>
    %c0_26 = arith.constant 0 : index
    %c0_27 = arith.constant 0 : index
    %c4 = arith.constant 4 : index
    %12 = vector.load %arg9[%c0_26, %c0_27, %c4] : memref<8x16x36xf32, #tpu.memory_space<vmem>>, vector<8x16x4xf32>
    tpu.vector_store %arg9[%c0_26, %c0_27, %c4], %11 {strides = array<i32>} : memref<8x16x36xf32, #tpu.memory_space<vmem>>, vector<8x16x4xf32>,
    %c0_28 = arith.constant 0 : index
    %c2 = arith.constant 2 : index
    %c0_29 = arith.constant 0 : index
    %13 = vector.load %arg8[%c0_28, %c2, %c0_29] : memref<10x18x4xf32, #tpu.memory_space<vmem>>, vector<8x16x4xf32>
    %c0_30 = arith.constant 0 : index
    %c0_31 = arith.constant 0 : index
    %c8_32 = arith.constant 8 : index
    %14 = vector.load %arg9[%c0_30, %c0_31, %c8_32] : memref<8x16x36xf32, #tpu.memory_space<vmem>>, vector<8x16x4xf32>
    tpu.vector_store %arg9[%c0_30, %c0_31, %c8_32], %13 {strides = array<i32>} : memref<8x16x36xf32, #tpu.memory_space<vmem>>, vector<8x16x4xf32>,
    %c1_33 = arith.constant 1 : index
    %c0_34 = arith.constant 0 : index
    %c0_35 = arith.constant 0 : index
    %15 = vector.load %arg8[%c1_33, %c0_34, %c0_35] : memref<10x18x4xf32, #tpu.memory_space<vmem>>, vector<8x16x4xf32>
    %c0_36 = arith.constant 0 : index
    %c0_37 = arith.constant 0 : index
    %c12 = arith.constant 12 : index
    %16 = vector.load %arg9[%c0_36, %c0_37, %c12] : memref<8x16x36xf32, #tpu.memory_space<vmem>>, vector<8x16x4xf32>
    tpu.vector_store %arg9[%c0_36, %c0_37, %c12], %15 {strides = array<i32>} : memref<8x16x36xf32, #tpu.memory_space<vmem>>, vector<8x16x4xf32>,
    %c1_38 = arith.constant 1 : index
    %c1_39 = arith.constant 1 : index
    %c0_40 = arith.constant 0 : index
    %17 = vector.load %arg8[%c1_38, %c1_39, %c0_40] : memref<10x18x4xf32, #tpu.memory_space<vmem>>, vector<8x16x4xf32>
    %c0_41 = arith.constant 0 : index
    %c0_42 = arith.constant 0 : index
    %c16 = arith.constant 16 : index
    %18 = vector.load %arg9[%c0_41, %c0_42, %c16] : memref<8x16x36xf32, #tpu.memory_space<vmem>>, vector<8x16x4xf32>
    tpu.vector_store %arg9[%c0_41, %c0_42, %c16], %17 {strides = array<i32>} : memref<8x16x36xf32, #tpu.memory_space<vmem>>, vector<8x16x4xf32>,
    %c1_43 = arith.constant 1 : index
    %c2_44 = arith.constant 2 : index
    %c0_45 = arith.constant 0 : index
    %19 = vector.load %arg8[%c1_43, %c2_44, %c0_45] : memref<10x18x4xf32, #tpu.memory_space<vmem>>, vector<8x16x4xf32>
    %c0_46 = arith.constant 0 : index
    %c0_47 = arith.constant 0 : index
    %c20 = arith.constant 20 : index
    %20 = vector.load %arg9[%c0_46, %c0_47, %c20] : memref<8x16x36xf32, #tpu.memory_space<vmem>>, vector<8x16x4xf32>
    tpu.vector_store %arg9[%c0_46, %c0_47, %c20], %19 {strides = array<i32>} : memref<8x16x36xf32, #tpu.memory_space<vmem>>, vector<8x16x4xf32>,
    %c2_48 = arith.constant 2 : index
    %c0_49 = arith.constant 0 : index
    %c0_50 = arith.constant 0 : index
    %21 = vector.load %arg8[%c2_48, %c0_49, %c0_50] : memref<10x18x4xf32, #tpu.memory_space<vmem>>, vector<8x16x4xf32>
    %c0_51 = arith.constant 0 : index
    %c0_52 = arith.constant 0 : index
    %c24 = arith.constant 24 : index
    %22 = vector.load %arg9[%c0_51, %c0_52, %c24] : memref<8x16x36xf32, #tpu.memory_space<vmem>>, vector<8x16x4xf32>
    tpu.vector_store %arg9[%c0_51, %c0_52, %c24], %21 {strides = array<i32>} : memref<8x16x36xf32, #tpu.memory_space<vmem>>, vector<8x16x4xf32>,
    %c2_53 = arith.constant 2 : index
    %c1_54 = arith.constant 1 : index
    %c0_55 = arith.constant 0 : index
    %23 = vector.load %arg8[%c2_53, %c1_54, %c0_55] : memref<10x18x4xf32, #tpu.memory_space<vmem>>, vector<8x16x4xf32>
    %c0_56 = arith.constant 0 : index
    %c0_57 = arith.constant 0 : index
    %c28 = arith.constant 28 : index
    %24 = vector.load %arg9[%c0_56, %c0_57, %c28] : memref<8x16x36xf32, #tpu.memory_space<vmem>>, vector<8x16x4xf32>
    tpu.vector_store %arg9[%c0_56, %c0_57, %c28], %23 {strides = array<i32>} : memref<8x16x36xf32, #tpu.memory_space<vmem>>, vector<8x16x4xf32>,
    %c2_58 = arith.constant 2 : index
    %c2_59 = arith.constant 2 : index
    %c0_60 = arith.constant 0 : index
    %25 = vector.load %arg8[%c2_58, %c2_59, %c0_60] : memref<10x18x4xf32, #tpu.memory_space<vmem>>, vector<8x16x4xf32>
    %c0_61 = arith.constant 0 : index
    %c0_62 = arith.constant 0 : index
    %c32 = arith.constant 32 : index
    %26 = vector.load %arg9[%c0_61, %c0_62, %c32] : memref<8x16x36xf32, #tpu.memory_space<vmem>>, vector<8x16x4xf32>
    tpu.vector_store %arg9[%c0_61, %c0_62, %c32], %25 {strides = array<i32>} : memref<8x16x36xf32, #tpu.memory_space<vmem>>, vector<8x16x4xf32>,
    %c0_63 = arith.constant 0 : index
    %c0_64 = arith.constant 0 : index
    %c0_65 = arith.constant 0 : index
    %27 = vector.load %arg9[%c0_63, %c0_64, %c0_65] : memref<8x16x36xf32, #tpu.memory_space<vmem>>, vector<8x16x36xf32>
    %28 = vector.shape_cast %27 : vector<8x16x36xf32> to vector<128x36xf32>
    %c0_66 = arith.constant 0 : index
    %c0_67 = arith.constant 0 : index
    %29 = vector.load %arg5[%c0_66, %c0_67] : memref<36x16xf32, #tpu.memory_space<vmem>>, vector<36x16xf32>
    %cst = arith.constant dense<0.000000e+00> : vector<128x16xf32>
    %30 = tpu.matmul %28, %29, %cst {dimension_numbers = #tpu.dot_dimension_numbers<[1], [0], [0], [1], [0, 0, 1, 1], [], []>} : vector<128x36xf32>, vector<36x16xf32>, vector<128x16xf32> -> vector<128x16xf32>
    %c0_68 = arith.constant 0 : index
    %c0_69 = arith.constant 0 : index
    %31 = vector.load %arg6[%c0_68, %c0_69] : memref<1x16xf32, #tpu.memory_space<vmem>>, vector<1x16xf32>
    %32 = vector.broadcast %31 : vector<1x16xf32> to vector<128x16xf32>
    %33 = arith.addf %30, %32 : vector<128x16xf32>
    %34 = vector.shape_cast %33 : vector<128x16xf32> to vector<8x16x16xf32>
    %c0_70 = arith.constant 0 : index
    %c0_71 = arith.constant 0 : index
    %c0_72 = arith.constant 0 : index
    %c0_73 = arith.constant 0 : index
    %35 = vector.load %arg7[%c0_70, %c0_71, %c0_72, %c0_73] : memref<1x8x16x16xf32, #tpu.memory_space<vmem>>, vector<1x8x16x16xf32>
    %36 = vector.shape_cast %35 : vector<1x8x16x16xf32> to vector<8x16x16xf32>
    %37 = vector.shape_cast %34 : vector<8x16x16xf32> to vector<1x8x16x16xf32>
    tpu.vector_store %arg7[%c0_70, %c0_71, %c0_72, %c0_73], %37 {strides = array<i32>} : memref<1x8x16x16xf32, #tpu.memory_space<vmem>>, vector<1x8x16x16xf32>,
    return
  }
  func.func @transform_0(%arg0: i32, %arg1: i32) -> (i32, i32, i32, i32) {
    %c0_i32 = arith.constant 0 : i32
    %c0_i32_0 = arith.constant 0 : i32
    %c0_i32_1 = arith.constant 0 : i32
    return %arg0, %arg1, %c0_i32, %c0_i32_0 : i32, i32, i32, i32
  }
  func.func @transform_1(%arg0: i32, %arg1: i32) -> (i32, i32, i32, i32) {
    %c1_i32 = arith.constant 1 : i32
    %0 = arith.addi %arg1, %c1_i32 : i32
    %c8_i32 = arith.constant 8 : i32
    %1 = arith.muli %0, %c8_i32 : i32
    %c0_i32 = arith.constant 0 : i32
    %c0_i32_0 = arith.constant 0 : i32
    %c0_i32_1 = arith.constant 0 : i32
    return %arg0, %1, %c0_i32, %c0_i32_0 : i32, i32, i32, i32
  }
  func.func @transform_2(%arg0: i32, %arg1: i32) -> (i32, i32, i32, i32) {
    %c1_i32 = arith.constant 1 : i32
    %0 = arith.addi %arg1, %c1_i32 : i32
    %c8_i32 = arith.constant 8 : i32
    %1 = arith.muli %0, %c8_i32 : i32
    %c1_i32_0 = arith.constant 1 : i32
    %2 = arith.addi %1, %c1_i32_0 : i32
    %c0_i32 = arith.constant 0 : i32
    %c0_i32_1 = arith.constant 0 : i32
    %c0_i32_2 = arith.constant 0 : i32
    return %arg0, %2, %c0_i32, %c0_i32_1 : i32, i32, i32, i32
  }
  func.func @transform_3(%arg0: i32, %arg1: i32) -> (i32, i32) {
    %c0_i32 = arith.constant 0 : i32
    %c0_i32_0 = arith.constant 0 : i32
    %c0_i32_1 = arith.constant 0 : i32
    return %c0_i32, %c0_i32_0 : i32, i32
  }
  func.func @transform_4(%arg0: i32, %arg1: i32) -> (i32, i32) {
    %c0_i32 = arith.constant 0 : i32
    %c0_i32_0 = arith.constant 0 : i32
    %c0_i32_1 = arith.constant 0 : i32
    return %c0_i32, %c0_i32_0 : i32, i32
  }
  func.func @transform_5(%arg0: i32, %arg1: i32) -> (i32, i32, i32, i32) {
    %c0_i32 = arith.constant 0 : i32
    %c0_i32_0 = arith.constant 0 : i32
    %c0_i32_1 = arith.constant 0 : i32
    return %arg0, %arg1, %c0_i32, %c0_i32_0 : i32, i32, i32, i32
  }
}

</mosaic_0001>

<bundles_post_ra>
// kernel: tpu_custom_call.1
= control target key start
LH: loop header
LB: loop body
LE: loop exit
PB: predicated region body
PF: predicated region fallthrough
CT: control target
= control target key end

     0   :  { %10 = vsyncpa [#allocation5], 0  ;;  %s2644_s0 = inlined_call_operand.vmem [shape: f32[2,18,18,4], index: 0, kind: input, shape index: {}]   ;;  %s2645_s1 = inlined_call_operand.vmem [shape: f32[2,18,18,4], index: 1, kind: input, shape index: {}]   ;;  %s2646_s2 = inlined_call_operand.vmem [shape: f32[2,18,18,4], index: 2, kind: input, shape index: {}]   ;;  %s2647_s3 = inlined_call_operand.vmem [shape: f32[36,16], index: 3, kind: input, shape index: {}]   ;;  %s2648_s4 = inlined_call_operand.vmem [shape: f32[1,16], index: 4, kind: input, shape index: {}]   ;;  %s2649_s5 = inlined_call_operand.hbm [shape: f32[2,16,16,16], index: 5, kind: output, shape index: {}]  }
   0x1   :  { %12 = vsyncpa [#allocation5 + $0x1], 0  ;;  %s1983_s18 = smov 0   ;;  %s1985_s19 = smov 0  }
   0x2   :  { %s1987_s20 = smov 0   ;;  %s1989_s21 = smov 0  }
   0x3   :  { %s1991_s22 = smov 0   ;;  %s1993_s23 = smov 0  }
   0x4   :  { %s1995_s24 = smov 0   ;;  %s1997_s25 = smov 0  }
   0x5 LB: > { %s1646_s26 = sadd.s32 4294967295, %s1941_s25   ;;  %s1647_s27 = sadd.s32 4294967294, %s1941_s25   ;;  %s1941_s25 = sphi %s1997_s25, %s18_s25   ;;  %s1937_s24 = sphi %s1995_s24, %s2682_s24   ;;  %s1933_s23 = sphi %s1993_s23, %s2681_s23   ;;  %s1929_s22 = sphi %s1991_s22, %s2680_s22   ;;  %s1925_s21 = sphi %s1989_s21, %s2679_s21   ;;  %s1921_s20 = sphi %s1987_s20, %s2678_s20   ;;  %s1917_s19 = sphi %s1985_s19, %s2677_s19   ;;  %s1913_s18 = sphi %s1983_s18, %s2676_s18  }
   0x6   : > { %s27_s28 = sadd.s32 1, %s1933_s23  ;;  %s30_s29 = sadd.s32 1, %s1937_s24 }
   0x7   : > { %p28_p0 = scmp.ge.s32.totalorder %s27_s28, 2  ;;  %p185_p1 = scmp.ne.s32.totalorder %s1921_s20, %s1917_s19 }
   0x8   : > { %p186_p2 = scmp.eq.s32.totalorder %s1646_s26, 3  ;;  %p191_p5 = scmp.ne.s32.totalorder %s1917_s19, %s1913_s18 }
   0x9   : > { %s2684_s28 = smov (%p28_p0, %s27_s28), 0  ;;  %s2686_s29 = smov (!%p28_p0, %s30_s29), %s1937_s24 }
   0xa   : > { %s171_s30 = ssub.s32 %s1933_s23, %s2684_s28  ;;  %p2034_p3 = por %p186_p2, %p185_p1 }
   0xb   : > { %p32_p4 = scmp.ge.s32.totalorder %s2686_s29, 2  ;;  %p192_p6 = scmp.eq.s32.totalorder %s1647_s27, 3 }
   0xc   : > { %p1654_p7 = scmp.ge.s32.totalorder %s1941_s25, 1  ;;  %p274_p9 = scmp.lt.s32.totalorder %s1941_s25, 5 }
   0xd   : > { %s2688_s29 = smov (%p32_p4, %s2686_s29), 0  ;;  %p2043_p8 = por %p192_p6, %p191_p5 }
   0xe   : > { %s170_s8 = ssub.s32 %s1937_s24, %s2688_s29  ;;  %s175_s9 = sadd.s32 1, %s1921_s20 }
   0xf   : > { %s172_s10 = sor.u32 %s171_s30, %s170_s8  ;;  %p275_p10 = pnand %p1654_p7, %p274_p9 }
  0x10   : > { %p173_p11 = scmp.eq.s32.totalorder %s172_s10, 0  ;;  %s2055_s12 = sshll.u32 (!%p275_p10), %s1925_s21, 3 }
  0x11   : > { %278 = sbr.rel (%p275_p10) target bundleno = 628 (0x274), region = 40  ;;  %p341_p12 = scmp.lt.s32.totalorder (!%p275_p10), %s1929_s22, 1 }
  0x12   : > { %s2052_s11 = scalar_select %p173_p11, %s1921_s20, %s175_s9  }
  0x13   : > { %p343_p13 = scmp.lt.s32.totalorder (!%p275_p10), %s2055_s12, 17  ;;  %s2662_s9 = smov (!%p275_p10), 4  }
  0x14   : > { %s2656_s10 = smov (!%p275_p10), 8  }
  0x16   : > { %s342_s13 = scalar_select %p341_p12, %s1929_s22, 1  ;;  %vm409_vm0 = vcmask 31744   ;;  %vm412_vm1 = vcmask 25600   ;;  %vm1336_vm2 = vcmask 1043456   ;;  %vm561_vm3 = vcmask 64544  }
  0x17   : > { %s344_s14 = scalar_select %p343_p13, %s2055_s12, 17  ;;  %vm658_vm4 = vcmask 97344   ;;  %vm756_vm5 = vcmask 130144   ;;  %vm853_vm6 = vcmask 162944   ;;  %vm950_vm7 = vcmask 195744  }
  0x18   : > { %s2061_s15 = smul.u32 54, %s342_s13  ;;  %s2652_s13 = smov 12   ;;  %vm1048_vm8 = vcmask 228544   ;;  %vm1145_vm9 = vcmask 261344   ;;  %vm1242_vm10 = vcmask 294144   ;;  %vm1287_vm11 = vcmask 293888  }
  0x19   : > { %s1765_s16 = smul.u32 3, %s344_s14  ;;  %s2650_s14 = smov 16   ;;  %vm1485_vm12 = vcmask 130048  }
  0x1b   : > { %s347_s17 = sadd.s32 %s2061_s15, %s1765_s16  ;;  %s2211_s16 = sadd.s32 8, %s2055_s12 }
  0x1c   : > { %s1657_s26 = sshll.u32 %s347_s17, 3  ;;  %p360_p0 = scmp.lt.s32.totalorder %s2211_s16, 17 }
  0x1d   : > { %s2067_s8 = scalar_lea.vmem %s2644_s0, %s1657_s26  ;;  %s2658_s17 = smov 20  }
  0x1e   : > { %v386_v0 = vld [vmem:[%s2067_s8 + $0x8] sm:$0xff]  ;;  %v387_v1 = vld [vmem:[%s2067_s8 + $0x10] sm:$0x3]  ;;  %v385_v2 = vld [vmem:[%s2067_s8] sm:$0xff]  ;;  %s361_s26 = scalar_select %p360_p0, %s2211_s16, 17 }
  0x1f   : > { %411 = vst.msk [vmem:[#allocation2 + $0x8] sm:$0xff] %vm409_vm0, %v386_v0  ;;  %410 = vst.msk [vmem:[#allocation2] sm:$0xff] %vm409_vm0, %v385_v2  ;;  %v398_v3 = vld [vmem:[%s2067_s8 + $0x68] sm:$0xff]  ;;  %v399_v4 = vld [vmem:[%s2067_s8 + $0x70] sm:$0x3] }
  0x20   : > { %413 = vst.msk [vmem:[#allocation2 + $0x10] sm:$0x3] %vm412_vm1, %v387_v1  ;;  %v397_v5 = vld [vmem:[%s2067_s8 + $0x60] sm:$0xff]  ;;  %425 = vst.msk [vmem:[#allocation2 + $0x70] sm:$0x3] %vm412_vm1, %v399_v4  ;;  %v400_v6 = vld [vmem:[%s2067_s8 + $0x78] sm:$0xff] }
  0x21   : > { %424 = vst.msk [vmem:[#allocation2 + $0x68] sm:$0xff] %vm409_vm0, %v398_v3  ;;  %423 = vst.msk [vmem:[#allocation2 + $0x60] sm:$0xff] %vm409_vm0, %v397_v5  ;;  %v388_v7 = vld [vmem:[%s2067_s8 + $0x18] sm:$0xff]  ;;  %v401_v8 = vld [vmem:[%s2067_s8 + $0x80] sm:$0xff]  ;;  %s1767_s27 = smul.u32 3, %s361_s26  ;;  %s2654_s26 = smov 24  }
  0x22   : > { %426 = vst.msk [vmem:[#allocation2 + $0x78] sm:$0xff] %vm409_vm0, %v400_v6  ;;  %414 = vst.msk [vmem:[#allocation2 + $0x18] sm:$0xff] %vm409_vm0, %v388_v7  ;;  %v389_v9 = vld [vmem:[%s2067_s8 + $0x20] sm:$0xff]  ;;  %v402_v10 = vld [vmem:[%s2067_s8 + $0x88] sm:$0x3] }
  0x23   : > { %427 = vst.msk [vmem:[#allocation2 + $0x80] sm:$0xff] %vm409_vm0, %v401_v8  ;;  %v390_v11 = vld [vmem:[%s2067_s8 + $0x28] sm:$0x3]  ;;  %415 = vst.msk [vmem:[#allocation2 + $0x20] sm:$0xff] %vm409_vm0, %v389_v9  ;;  %v403_v12 = vld [vmem:[%s2067_s8 + $0x90] sm:$0xff]  ;;  %s364_s30 = sadd.s32 %s1767_s27, %s2061_s15  ;;  %s2660_s27 = smov 28  }
  0x24   : > { %428 = vst.msk [vmem:[#allocation2 + $0x88] sm:$0x3] %vm412_vm1, %v402_v10  ;;  %416 = vst.msk [vmem:[#allocation2 + $0x28] sm:$0x3] %vm412_vm1, %v390_v11  ;;  %v391_v13 = vld [vmem:[%s2067_s8 + $0x30] sm:$0xff]  ;;  %v404_v14 = vld [vmem:[%s2067_s8 + $0x98] sm:$0xff] }
  0x25   : > { %429 = vst.msk [vmem:[#allocation2 + $0x90] sm:$0xff] %vm409_vm0, %v403_v12  ;;  %417 = vst.msk [vmem:[#allocation2 + $0x30] sm:$0xff] %vm409_vm0, %v391_v13  ;;  %v392_v15 = vld [vmem:[%s2067_s8 + $0x38] sm:$0xff]  ;;  %v405_v16 = vld [vmem:[%s2067_s8 + $0xa0] sm:$0x3] }
  0x26   : > { %430 = vst.msk [vmem:[#allocation2 + $0x98] sm:$0xff] %vm409_vm0, %v404_v14  ;;  %v393_v17 = vld [vmem:[%s2067_s8 + $0x40] sm:$0x3]  ;;  %418 = vst.msk [vmem:[#allocation2 + $0x38] sm:$0xff] %vm409_vm0, %v392_v15  ;;  %v406_v18 = vld [vmem:[%s2067_s8 + $0xa8] sm:$0xff] }
  0x27   : > { %431 = vst.msk [vmem:[#allocation2 + $0xa0] sm:$0x3] %vm412_vm1, %v405_v16  ;;  %419 = vst.msk [vmem:[#allocation2 + $0x40] sm:$0x3] %vm412_vm1, %v393_v17  ;;  %v394_v19 = vld [vmem:[%s2067_s8 + $0x48] sm:$0xff]  ;;  %v407_v20 = vld [vmem:[%s2067_s8 + $0xb0] sm:$0xff] }
  0x28   : > { %432 = vst.msk [vmem:[#allocation2 + $0xa8] sm:$0xff] %vm409_vm0, %v406_v18  ;;  %420 = vst.msk [vmem:[#allocation2 + $0x48] sm:$0xff] %vm409_vm0, %v394_v19  ;;  %v395_v21 = vld [vmem:[%s2067_s8 + $0x50] sm:$0xff]  ;;  %v481_v23 = vld [vmem:[#allocation2 + $0x1] sm:$0xff] }
  0x29   : > { %433 = vst.msk [vmem:[#allocation2 + $0xb0] sm:$0xff] %vm409_vm0, %v407_v20  ;;  %v482_v22 = vld [vmem:[#allocation2 + $0x9] sm:$0xff]  ;;  %421 = vst.msk [vmem:[#allocation2 + $0x50] sm:$0xff] %vm409_vm0, %v395_v21  ;;  %513 = vrot.lane.b32.xlu0 %v481_v23, %s2662_s9  ;;  %v2117_v25 = vld [vmem:[#allocation2 + $0x61] sm:$0xff] }
  0x2a   : > { %515 = vrot.lane.b32.xlu1 %v482_v22, %s2662_s9  ;;  %v2115_v24 = vld [vmem:[#allocation2 + $0x69] sm:$0xff]  ;;  %v2119_v26 = vld [vmem:[#allocation2 + $0x78] sm:$0xff]  ;;  %v2121_v28 = vld [vmem:[#allocation2 + $0x80] sm:$0xff] }
  0x2b   : > { %v676_v27 = vld [vmem:[#allocation2 + $0x18] sm:$0xff]  ;;  %v677_v29 = vld [vmem:[#allocation2 + $0x20] sm:$0xff]  ;;  %475 = vst.msk [vmem:[#allocation3 + $0x50] sm:$0xff] %vm409_vm0, %v2119_v26  ;;  %476 = vst.msk [vmem:[#allocation3 + $0x58] sm:$0xff] %vm409_vm0, %v2121_v28 }
  0x2c   : > { %467 = vst.msk [vmem:[#allocation3 + $0x10] sm:$0xff] %vm409_vm0, %v676_v27  ;;  %468 = vst.msk [vmem:[#allocation3 + $0x18] sm:$0xff] %vm409_vm0, %v677_v29  ;;  %v2133_v30 = vld [vmem:[#allocation2 + $0x62] sm:$0xff]  ;;  %v2135_v32 = vld [vmem:[#allocation2 + $0x90] sm:$0xff] }
  0x2d   : > { %529 = vrot.lane.b32.xlu0 %v2117_v25, %s2662_s9  ;;  %v578_v31 = vld [vmem:[#allocation2 + $0x2] sm:$0xff]  ;;  %v2137_v33 = vld [vmem:[#allocation2 + $0x30] sm:$0xff]  ;;  %v2139_v34 = vld [vmem:[#allocation2 + $0x98] sm:$0xff]  ;;  %477 = vst.msk [vmem:[#allocation3 + $0x60] sm:$0xff] %vm409_vm0, %v2135_v32 }
  0x2e   : > { %531 = vrot.lane.b32.xlu1 %v2115_v24, %s2662_s9  ;;  %v2141_v35 = vld [vmem:[#allocation2 + $0x38] sm:$0xff]  ;;  %469 = vst.msk [vmem:[#allocation3 + $0x20] sm:$0xff] %vm409_vm0, %v2137_v33  ;;  %478 = vst.msk [vmem:[#allocation3 + $0x68] sm:$0xff] %vm409_vm0, %v2139_v34  ;;  %v2154_v36 = vld [vmem:[#allocation2 + $0x6a] sm:$0xff] }
  0x2f   : > { %470 = vst.msk [vmem:[#allocation3 + $0x28] sm:$0xff] %vm409_vm0, %v2141_v35  ;;  %v579_v37 = vld [vmem:[#allocation2 + $0xa] sm:$0xff]  ;;  %v449_v39 = vld [vmem:[#allocation2] sm:$0xff]  ;;  %v408_v46 = vld [vmem:[%s2067_s8 + $0xb8] sm:$0x3] }
  0x30   : > { %v450_v38 = vld [vmem:[#allocation2 + $0x8] sm:$0xff]  ;;  %465 = vst.msk [vmem:[#allocation3] sm:$0xff] %vm409_vm0, %v449_v39  ;;  %v2164_v43 = vld [vmem:[#allocation2 + $0x60] sm:$0xff]  ;;  %v2166_v44 = vld [vmem:[#allocation2 + $0xb0] sm:$0xff] }
  0x31   : > { %610 = vrot.lane.b32.xlu0 %v578_v31, %s2656_s10  ;;  %466 = vst.msk [vmem:[#allocation3 + $0x8] sm:$0xff] %vm409_vm0, %v450_v38  ;;  %v2157_v40 = vld [vmem:[#allocation2 + $0xa8] sm:$0xff]  ;;  %473 = vst.msk [vmem:[#allocation3 + $0x40] sm:$0xff] %vm409_vm0, %v2164_v43  ;;  %v2179_v45 = vld [vmem:[#allocation2 + $0x50] sm:$0xff] }
  0x32   : > { %626 = vrot.lane.b32.xlu1 %v2133_v30, %s2656_s10  ;;  %v2159_v41 = vld [vmem:[#allocation2 + $0x48] sm:$0xff]  ;;  %479 = vst.msk [vmem:[#allocation3 + $0x70] sm:$0xff] %vm409_vm0, %v2157_v40  ;;  %480 = vst.msk [vmem:[#allocation3 + $0x78] sm:$0xff] %vm409_vm0, %v2166_v44  ;;  %v396_v47 = vld [vmem:[%s2067_s8 + $0x58] sm:$0x3]  ;;  %s1659_s8 = sshll.u32 %s364_s30, 3 }
  0x33   : > { %v2162_v42 = vld [vmem:[#allocation2 + $0x68] sm:$0xff]  ;;  %471 = vst.msk [vmem:[#allocation3 + $0x30] sm:$0xff] %vm409_vm0, %v2159_v41  ;;  %472 = vst.msk [vmem:[#allocation3 + $0x38] sm:$0xff] %vm409_vm0, %v2179_v45  ;;  %v2195_v48 = vld [vmem:[#allocation2 + $0x79] sm:$0xff]  ;;  %s2669_s30 = smov 16  }
  0x34   : > { %474 = vst.msk [vmem:[#allocation3 + $0x48] sm:$0xff] %vm409_vm0, %v2162_v42  ;;  %v773_v49 = vld [vmem:[#allocation2 + $0x19] sm:$0xff]  ;;  %v2203_v50 = vld [vmem:[#allocation2 + $0x81] sm:$0xff]  ;;  %v1073_v58 = vld [vmem:[#allocation2 + $0x91] sm:$0xff] }
  0x35   : > { %612 = vrot.lane.b32.xlu0 %v579_v37, %s2656_s10  ;;  %434 = vst.msk [vmem:[#allocation2 + $0xb8] sm:$0x3] %vm412_vm1, %v408_v46  ;;  %422 = vst.msk [vmem:[#allocation2 + $0x58] sm:$0x3] %vm412_vm1, %v396_v47  ;;  %v774_v51 = vld [vmem:[#allocation2 + $0x21] sm:$0xff]  ;;  %v1065_v59 = vld [vmem:[#allocation2 + $0x31] sm:$0xff] }
  0x36   : > { %628 = vrot.lane.b32.xlu1 %v2154_v36, %s2656_s10  ;;  %v2208_v52 = vld [vmem:[#allocation2 + $0x7a] sm:$0xff]  ;;  %v2229_v55 = vld [vmem:[#allocation2 + $0x82] sm:$0xff]  ;;  %v1170_v63 = vld [vmem:[#allocation2 + $0x92] sm:$0xff] }
  0x37   : > { %v870_v53 = vld [vmem:[#allocation2 + $0x1a] sm:$0xff]  ;;  %v871_v56 = vld [vmem:[#allocation2 + $0x22] sm:$0xff]  ;;  %v1162_v0 = vld [vmem:[#allocation2 + $0x32] sm:$0xff] }
  0x38   : > { %v1074_v61 = vld [vmem:[#allocation2 + $0x99] sm:$0xff]  ;;  %v1277_v3 = vld [vmem:[%s2647_s3 + $0x10] sm:$0xff]  ;;  %v1276_v4 = vld [vmem:[%s2647_s3 + $0x8] sm:$0xff] }
  0x39   : > { %708 = vrot.lane.b32.xlu0 %v676_v27, %s2652_s13  ;;  %v1066_v62 = vld [vmem:[#allocation2 + $0x39] sm:$0xff]  ;;  %v1075_v19 = vld [vmem:[#allocation2 + $0xa9] sm:$0xff] }
  0x3a   : > { %724 = vrot.lane.b32.xlu1 %v2119_v26, %s2652_s13  ;;  %v1279_v1 = vld [vmem:[%s2647_s3 + $0x20] sm:$0xf]  ;;  %v1278_v2 = vld [vmem:[%s2647_s3 + $0x18] sm:$0xff]  ;;  %v1067_v20 = vld [vmem:[#allocation2 + $0x49] sm:$0xff] }
  0x3b   : > { %1721 = vmatprep.subr.msk.mxu0 %vm1336_vm2, %v1279_v1  ;;  %1755 = vmatprep.subr.msk.mxu1 %vm1336_vm2, %v1279_v1  ;;  %v1275_v5 = vld [vmem:[%s2647_s3] sm:$0xff]  ;;  %v1172_v37 = vld [vmem:[#allocation2 + $0xaa] sm:$0xff] }
  0x3c   : > { %1722 = vmatpush3.msk.msra.mxu0 %vm1336_vm2, %v1279_v1  ;;  %1760 = vmatpush3.msk.msra.mxu1 %vm1336_vm2, %v1279_v1  ;;  %v1171_v7 = vld [vmem:[#allocation2 + $0x9a] sm:$0xff]  ;;  %v1164_v38 = vld [vmem:[#allocation2 + $0x4a] sm:$0xff] }
  0x3d   : > { %710 = vrot.lane.b32.xlu0 %v677_v29, %s2652_s13  ;;  %1723 = vmatprep.subr.mxu0 %v1278_v2  ;;  %v1163_v8 = vld [vmem:[#allocation2 + $0x3a] sm:$0xff] }
  0x3e   : > { %726 = vrot.lane.b32.xlu1 %v2121_v28, %s2652_s13  ;;  %s366_s13 = scalar_lea.vmem %s2645_s1, %s1659_s8  ;;  %1756 = vmatprep.subr.mxu1 %v1278_v2 }
  0x3f   : > { %v435_v54 = vld [vmem:[%s366_s13] sm:$0xff]  ;;  %v436_v57 = vld [vmem:[%s366_s13 + $0x8] sm:$0xff]  ;;  %v437_v60 = vld [vmem:[%s366_s13 + $0x10] sm:$0x3]  ;;  %s2664_s13 = smov 32   ;;  %1724 = vmatpush3.msra.mxu0 %v1278_v2  ;;  %1761 = vmatpush3.msra.mxu1 %v1278_v2 }
  0x40   : > { %439 = vst.msk [vmem:[#allocation2 + $0xc0] sm:$0xff] %vm409_vm0, %v435_v54  ;;  %440 = vst.msk [vmem:[#allocation2 + $0xc8] sm:$0xff] %vm409_vm0, %v436_v57  ;;  %1725 = vmatprep.subr.mxu0 %v1277_v3  ;;  %1757 = vmatprep.subr.mxu1 %v1277_v3 }
  0x41   : > { %805 = vrot.lane.b32.xlu0 %v773_v49, %s2650_s14  ;;  %441 = vst.msk [vmem:[#allocation2 + $0xd0] sm:$0x3] %vm412_vm1, %v437_v60  ;;  %1726 = vmatpush3.msra.mxu0 %v1277_v3 }
  0x42   : > { %821 = vrot.lane.b32.xlu1 %v2195_v48, %s2650_s14  ;;  %1762 = vmatpush3.msra.mxu1 %v1277_v3 }
  0x43   : > { %1727 = vmatprep.subr.mxu0 %v1276_v4  ;;  %1758 = vmatprep.subr.mxu1 %v1276_v4 }
  0x44   : > { %1728 = vmatpush3.msra.mxu0 %v1276_v4  ;;  %1763 = vmatpush3.msra.mxu1 %v1276_v4 }
  0x45   : > { %517 = vrot.lane.b32.xlu0 %v773_v49, %s2662_s9  ;;  %1729 = vmatprep.subr.mxu0 %v1275_v5 }
  0x46   : > { %533 = vrot.lane.b32.xlu1 %v2195_v48, %s2662_s9  ;;  %1759 = vmatprep.subr.mxu1 %v1275_v5 }
  0x47   : > { %1730 = vmatpush3.msra.mxu0 %v1275_v5  ;;  %1764 = vmatpush3.msra.mxu1 %v1275_v5 }
  0x49   : > { %807 = vrot.lane.b32.xlu0 %v774_v51, %s2650_s14 }
  0x4a   : > { %823 = vrot.lane.b32.xlu1 %v2203_v50, %s2650_s14  ;;  %s2668_s14 = smov 12  }
  0x4d   : > { %902 = vrot.lane.b32.xlu0 %v870_v53, %s2658_s17 }
  0x4e   : > { %918 = vrot.lane.b32.xlu1 %v2208_v52, %s2658_s17 }
  0x51   : > { %519 = vrot.lane.b32.xlu0 %v774_v51, %s2662_s9  ;;  %v1173_v51 = vld [vmem:[#allocation2 + $0xb2] sm:$0xff] }
  0x52   : > { %535 = vrot.lane.b32.xlu1 %v2203_v50, %s2662_s9 }
  0x55   : > { %614 = vrot.lane.b32.xlu0 %v870_v53, %s2656_s10  ;;  %v1165_v53 = vld [vmem:[#allocation2 + $0x52] sm:$0xff] }
  0x56   : > { %630 = vrot.lane.b32.xlu1 %v2208_v52, %s2656_s10 }
  0x59   : > { %904 = vrot.lane.b32.xlu0 %v871_v56, %s2658_s17 }
  0x5a   : > { %920 = vrot.lane.b32.xlu1 %v2229_v55, %s2658_s17 }
  0x5d   : > { %1000 = vrot.lane.b32.xlu0 %v2137_v33, %s2654_s26 }
  0x5e   : > { %1016 = vrot.lane.b32.xlu1 %v2135_v32, %s2654_s26 }
  0x61   : > { %616 = vrot.lane.b32.xlu0 %v871_v56, %s2656_s10 }
  0x62   : > { %632 = vrot.lane.b32.xlu1 %v2229_v55, %s2656_s10  ;;  %s2670_s10 = smov 20  }
  0x65   : > { %712 = vrot.lane.b32.xlu0 %v2137_v33, %s2668_s14  ;;  %v1068_v33 = vld [vmem:[#allocation2 + $0x51] sm:$0xff] }
  0x66   : > { %728 = vrot.lane.b32.xlu1 %v2135_v32, %s2668_s14  ;;  %v1076_v32 = vld [vmem:[#allocation2 + $0xb1] sm:$0xff] }
  0x69   : > { %1002 = vrot.lane.b32.xlu0 %v2141_v35, %s2654_s26 }
  0x6a   : > { %1018 = vrot.lane.b32.xlu1 %v2139_v34, %s2654_s26  ;;  %s371_s26 = sadd.s32 1, %s2211_s16 }
  0x6b   : > { %p374_p1 = scmp.lt.s32.totalorder %s371_s26, 17 }
  0x6d   : > { %1097 = vrot.lane.b32.xlu0 %v1065_v59, %s2660_s27  ;;  %s2690_s26 = smov (!%p374_p1, %s371_s26), 17 }
  0x6e   : > { %1113 = vrot.lane.b32.xlu1 %v1073_v58, %s2660_s27  ;;  %s1768_s17 = smul.u32 3, %s2690_s26 }
  0x70   : > { %s378_s8 = sadd.s32 %s1768_s17, %s2061_s15  ;;  %s2671_s15 = smov 32  }
  0x71   : > { %714 = vrot.lane.b32.xlu0 %v2141_v35, %s2668_s14  ;;  %s1661_s12 = sshll.u32 %s378_s8, 3  ;;  %s2675_s17 = smov 28  }
  0x72   : > { %730 = vrot.lane.b32.xlu1 %v2139_v34, %s2668_s14  ;;  %s380_s26 = scalar_lea.vmem %s2646_s2, %s1661_s12  ;;  %s1951_s12 = smov [#allocation4]  }
  0x73   : > { %v442_v6 = vld [vmem:[%s380_s26] sm:$0xff]  ;;  %v443_v9 = vld [vmem:[%s380_s26 + $0x8] sm:$0xff]  ;;  %v444_v10 = vld [vmem:[%s380_s26 + $0x10] sm:$0x3]  ;;  %s1699_s26 = sshll.u32 %s1925_s21, 4 }
  0x74   : > { %446 = vst.msk [vmem:[#allocation2 + $0xd8] sm:$0xff] %vm409_vm0, %v442_v6  ;;  %447 = vst.msk [vmem:[#allocation2 + $0xe0] sm:$0xff] %vm409_vm0, %v443_v9  ;;  %v981_v6 = vld [vmem:[#allocation2 + $0xc8] sm:$0xff] }
  0x75   : > { %809 = vrot.lane.b32.xlu0 %v1065_v59, %s2669_s30  ;;  %448 = vst.msk [vmem:[#allocation2 + $0xe8] sm:$0x3] %vm412_vm1, %v444_v10  ;;  %v1077_v9 = vld [vmem:[#allocation2 + $0xc1] sm:$0xff] }
  0x76   : > { %825 = vrot.lane.b32.xlu1 %v1073_v58, %s2669_s30 }
  0x79   : > { %1099 = vrot.lane.b32.xlu0 %v1066_v62, %s2660_s27 }
  0x7a   : > { %1115 = vrot.lane.b32.xlu1 %v1074_v61, %s2660_s27  ;;  %s2673_s27 = smov 8  }
  0x7d   : > { %1194 = vrot.lane.b32.xlu0 %v1162_v0, %s2664_s13 }
  0x7e   : > { %1210 = vrot.lane.b32.xlu1 %v1170_v63, %s2664_s13  ;;  %s2674_s13 = smov 24  }
  0x81   : > { %521 = vrot.lane.b32.xlu0 %v1065_v59, %s2662_s9 }
  0x82   : > { %537 = vrot.lane.b32.xlu1 %v1073_v58, %s2662_s9  ;;  %s2672_s9 = smov 4  }
  0x85   : > { %811 = vrot.lane.b32.xlu0 %v1066_v62, %s2669_s30 }
  0x86   : > { %827 = vrot.lane.b32.xlu1 %v1074_v61, %s2669_s30 }
  0x89   : > { %906 = vrot.lane.b32.xlu0 %v1162_v0, %s2670_s10 }
  0x8a   : > { %922 = vrot.lane.b32.xlu1 %v1170_v63, %s2670_s10 }
  0x8d   : > { %1196 = vrot.lane.b32.xlu0 %v1163_v8, %s2671_s15 }
  0x8e   : > { %1212 = vrot.lane.b32.xlu1 %v1171_v7, %s2671_s15 }
  0x91   : > { %523 = vrot.lane.b32.xlu0 %v1066_v62, %s2672_s9 }
  0x92   : > { %539 = vrot.lane.b32.xlu1 %v1074_v61, %s2672_s9 }
  0x95   : > { %618 = vrot.lane.b32.xlu0 %v1162_v0, %s2673_s27 }
  0x96   : > { %634 = vrot.lane.b32.xlu1 %v1170_v63, %s2673_s27  ;;  %v980_v63 = vld [vmem:[#allocation2 + $0xc0] sm:$0xff] }
  0x99   : > { %908 = vrot.lane.b32.xlu0 %v1163_v8, %s2670_s10 }
  0x9a   : > { %924 = vrot.lane.b32.xlu1 %v1171_v7, %s2670_s10 }
  0x9b   : > { %v514_v12 = vpop.permute.xlu0 %513 }
  0x9c   : > { %v516_v11 = vpop.permute.xlu1 %515  ;;  %562 = vst.msk [vmem:[#allocation3] sm:$0xff] %vm561_vm3, %v514_v12 }
  0x9d   : > { %563 = vst.msk [vmem:[#allocation3 + $0x8] sm:$0xff] %vm561_vm3, %v516_v11  ;;  %1004 = vrot.lane.b32.xlu0 %v2159_v41, %s2674_s13 }
  0x9e   : > { %1020 = vrot.lane.b32.xlu1 %v2157_v40, %s2674_s13 }
  0x9f   : > { %v530_v14 = vpop.permute.xlu0 %529 }
  0xa0   : > { %v532_v13 = vpop.permute.xlu1 %531  ;;  %570 = vst.msk [vmem:[#allocation3 + $0x40] sm:$0xff] %vm561_vm3, %v530_v14 }
  0xa1   : > { %571 = vst.msk [vmem:[#allocation3 + $0x48] sm:$0xff] %vm561_vm3, %v532_v13  ;;  %620 = vrot.lane.b32.xlu0 %v1163_v8, %s2673_s27 }
  0xa2   : > { %636 = vrot.lane.b32.xlu1 %v1171_v7, %s2673_s27 }
  0xa3   : > { %v611_v16 = vpop.permute.xlu0 %610 }
  0xa4   : > { %v627_v15 = vpop.permute.xlu1 %626  ;;  %659 = vst.msk [vmem:[#allocation3] sm:$0xff] %vm658_vm4, %v611_v16 }
  0xa5   : > { %667 = vst.msk [vmem:[#allocation3 + $0x40] sm:$0xff] %vm658_vm4, %v627_v15  ;;  %716 = vrot.lane.b32.xlu0 %v2159_v41, %s2668_s14  ;;  %v1078_v15 = vld [vmem:[#allocation2 + $0xc9] sm:$0xff] }
  0xa6   : > { %732 = vrot.lane.b32.xlu1 %v2157_v40, %s2668_s14 }
  0xa7   : > { %v613_v18 = vpop.permute.xlu0 %612 }
  0xa8   : > { %v629_v17 = vpop.permute.xlu1 %628  ;;  %660 = vst.msk [vmem:[#allocation3 + $0x8] sm:$0xff] %vm658_vm4, %v613_v18 }
  0xa9   : > { %668 = vst.msk [vmem:[#allocation3 + $0x48] sm:$0xff] %vm658_vm4, %v629_v17  ;;  %1006 = vrot.lane.b32.xlu0 %v2179_v45, %s2674_s13 }
  0xaa   : > { %1022 = vrot.lane.b32.xlu1 %v2166_v44, %s2674_s13 }
  0xab   : > { %v709_v22 = vpop.permute.xlu0 %708 }
  0xac   : > { %v725_v21 = vpop.permute.xlu1 %724  ;;  %757 = vst.msk [vmem:[#allocation3] sm:$0xff] %vm756_vm5, %v709_v22 }
  0xad   : > { %765 = vst.msk [vmem:[#allocation3 + $0x40] sm:$0xff] %vm756_vm5, %v725_v21  ;;  %1101 = vrot.lane.b32.xlu0 %v1067_v20, %s2675_s17 }
  0xae   : > { %1117 = vrot.lane.b32.xlu1 %v1075_v19, %s2675_s17 }
  0xaf   : > { %v711_v27 = vpop.permute.xlu0 %710 }
  0xb0   : > { %v727_v23 = vpop.permute.xlu1 %726  ;;  %758 = vst.msk [vmem:[#allocation3 + $0x8] sm:$0xff] %vm756_vm5, %v711_v27 }
  0xb1   : > { %766 = vst.msk [vmem:[#allocation3 + $0x48] sm:$0xff] %vm756_vm5, %v727_v23  ;;  %718 = vrot.lane.b32.xlu0 %v2179_v45, %s2668_s14 }
  0xb2   : > { %734 = vrot.lane.b32.xlu1 %v2166_v44, %s2668_s14 }
  0xb3   : > { %v806_v31 = vpop.permute.xlu0 %805 }
  0xb4   : > { %v822_v29 = vpop.permute.xlu1 %821  ;;  %854 = vst.msk [vmem:[#allocation3] sm:$0xff] %vm853_vm6, %v806_v31 }
  0xb5   : > { %862 = vst.msk [vmem:[#allocation3 + $0x40] sm:$0xff] %vm853_vm6, %v822_v29  ;;  %813 = vrot.lane.b32.xlu0 %v1067_v20, %s2669_s30  ;;  %v1175_v29 = vld [vmem:[#allocation2 + $0xca] sm:$0xff] }
  0xb6   : > { %829 = vrot.lane.b32.xlu1 %v1075_v19, %s2669_s30 }
  0xb7   : > { %v518_v35 = vpop.permute.xlu0 %517 }
  0xb8   : > { %v534_v34 = vpop.permute.xlu1 %533  ;;  %564 = vst.msk [vmem:[#allocation3 + $0x10] sm:$0xff] %vm561_vm3, %v518_v35  ;;  %v982_v35 = vld [vmem:[#allocation2 + $0xd8] sm:$0xff] }
  0xb9   : > { %572 = vst.msk [vmem:[#allocation3 + $0x50] sm:$0xff] %vm561_vm3, %v534_v34  ;;  %1103 = vrot.lane.b32.xlu0 %v1068_v33, %s2675_s17 }
  0xba   : > { %1119 = vrot.lane.b32.xlu1 %v1076_v32, %s2675_s17 }
  0xbb   : > { %v808_v40 = vpop.permute.xlu0 %807 }
  0xbc   : > { %v824_v39 = vpop.permute.xlu1 %823  ;;  %855 = vst.msk [vmem:[#allocation3 + $0x8] sm:$0xff] %vm853_vm6, %v808_v40 }
  0xbd   : > { %863 = vst.msk [vmem:[#allocation3 + $0x48] sm:$0xff] %vm853_vm6, %v824_v39  ;;  %1198 = vrot.lane.b32.xlu0 %v1164_v38, %s2671_s15  ;;  %v983_v39 = vld [vmem:[#allocation2 + $0xe0] sm:$0xff] }
  0xbe   : > { %1214 = vrot.lane.b32.xlu1 %v1172_v37, %s2671_s15 }
  0xbf   : > { %v903_v44 = vpop.permute.xlu0 %902 }
  0xc0   : > { %v919_v41 = vpop.permute.xlu1 %918  ;;  %951 = vst.msk [vmem:[#allocation3] sm:$0xff] %vm950_vm7, %v903_v44 }
  0xc1   : > { %959 = vst.msk [vmem:[#allocation3 + $0x40] sm:$0xff] %vm950_vm7, %v919_v41  ;;  %525 = vrot.lane.b32.xlu0 %v1067_v20, %s2672_s9 }
  0xc2   : > { %541 = vrot.lane.b32.xlu1 %v1075_v19, %s2672_s9 }
  0xc3   : > { %v520_v46 = vpop.permute.xlu0 %519 }
  0xc4   : > { %v536_v45 = vpop.permute.xlu1 %535  ;;  %565 = vst.msk [vmem:[#allocation3 + $0x18] sm:$0xff] %vm561_vm3, %v520_v46 }
  0xc5   : > { %573 = vst.msk [vmem:[#allocation3 + $0x58] sm:$0xff] %vm561_vm3, %v536_v45  ;;  %815 = vrot.lane.b32.xlu0 %v1068_v33, %s2669_s30 }
  0xc6   : > { %831 = vrot.lane.b32.xlu1 %v1076_v32, %s2669_s30 }
  0xc7   : > { %v615_v49 = vpop.permute.xlu0 %614 }
  0xc8   : > { %v631_v47 = vpop.permute.xlu1 %630  ;;  %661 = vst.msk [vmem:[#allocation3 + $0x10] sm:$0xff] %vm658_vm4, %v615_v49 }
  0xc9   : > { %669 = vst.msk [vmem:[#allocation3 + $0x50] sm:$0xff] %vm658_vm4, %v631_v47  ;;  %910 = vrot.lane.b32.xlu0 %v1164_v38, %s2670_s10 }
  0xca   : > { %926 = vrot.lane.b32.xlu1 %v1172_v37, %s2670_s10 }
  0xcb   : > { %v905_v56 = vpop.permute.xlu0 %904 }
  0xcc   : > { %v921_v54 = vpop.permute.xlu1 %920  ;;  %952 = vst.msk [vmem:[#allocation3 + $0x8] sm:$0xff] %vm950_vm7, %v905_v56 }
  0xcd   : > { %960 = vst.msk [vmem:[#allocation3 + $0x48] sm:$0xff] %vm950_vm7, %v921_v54  ;;  %1200 = vrot.lane.b32.xlu0 %v1165_v53, %s2671_s15 }
  0xce   : > { %1216 = vrot.lane.b32.xlu1 %v1173_v51, %s2671_s15 }
  0xcf   : > { %v1001_v58 = vpop.permute.xlu0 %1000 }
  0xd0   : > { %v1017_v57 = vpop.permute.xlu1 %1016  ;;  %1049 = vst.msk [vmem:[#allocation3] sm:$0xff] %vm1048_vm8, %v1001_v58 }
  0xd1   : > { %1057 = vst.msk [vmem:[#allocation3 + $0x40] sm:$0xff] %vm1048_vm8, %v1017_v57  ;;  %527 = vrot.lane.b32.xlu0 %v1068_v33, %s2672_s9 }
  0xd2   : > { %543 = vrot.lane.b32.xlu1 %v1076_v32, %s2672_s9 }
  0xd3   : > { %v617_v60 = vpop.permute.xlu0 %616 }
  0xd4   : > { %v633_v59 = vpop.permute.xlu1 %632  ;;  %662 = vst.msk [vmem:[#allocation3 + $0x18] sm:$0xff] %vm658_vm4, %v617_v60 }
  0xd5   : > { %670 = vst.msk [vmem:[#allocation3 + $0x58] sm:$0xff] %vm658_vm4, %v633_v59  ;;  %622 = vrot.lane.b32.xlu0 %v1164_v38, %s2673_s27 }
  0xd6   : > { %638 = vrot.lane.b32.xlu1 %v1172_v37, %s2673_s27 }
  0xd7   : > { %v713_v62 = vpop.permute.xlu0 %712 }
  0xd8   : > { %v729_v61 = vpop.permute.xlu1 %728  ;;  %759 = vst.msk [vmem:[#allocation3 + $0x10] sm:$0xff] %vm756_vm5, %v713_v62 }
  0xd9   : > { %767 = vst.msk [vmem:[#allocation3 + $0x50] sm:$0xff] %vm756_vm5, %v729_v61  ;;  %912 = vrot.lane.b32.xlu0 %v1165_v53, %s2670_s10 }
  0xda   : > { %928 = vrot.lane.b32.xlu1 %v1173_v51, %s2670_s10 }
  0xdb   : > { %v1003_v1 = vpop.permute.xlu0 %1002 }
  0xdc   : > { %v1019_v0 = vpop.permute.xlu1 %1018  ;;  %1050 = vst.msk [vmem:[#allocation3 + $0x8] sm:$0xff] %vm1048_vm8, %v1003_v1 }
  0xdd   : > { %1058 = vst.msk [vmem:[#allocation3 + $0x48] sm:$0xff] %vm1048_vm8, %v1019_v0  ;;  %1008 = vrot.lane.b32.xlu0 %v2164_v43, %s2674_s13 }
  0xde   : > { %1024 = vrot.lane.b32.xlu1 %v980_v63, %s2674_s13 }
  0xdf   : > { %v1098_v3 = vpop.permute.xlu0 %1097 }
  0xe0   : > { %v1114_v2 = vpop.permute.xlu1 %1113  ;;  %1146 = vst.msk [vmem:[#allocation3] sm:$0xff] %vm1145_vm9, %v1098_v3 }
  0xe1   : > { %1154 = vst.msk [vmem:[#allocation3 + $0x40] sm:$0xff] %vm1145_vm9, %v1114_v2  ;;  %624 = vrot.lane.b32.xlu0 %v1165_v53, %s2673_s27 }
  0xe2   : > { %640 = vrot.lane.b32.xlu1 %v1173_v51, %s2673_s27 }
  0xe3   : > { %v715_v5 = vpop.permute.xlu0 %714 }
  0xe4   : > { %v731_v4 = vpop.permute.xlu1 %730  ;;  %760 = vst.msk [vmem:[#allocation3 + $0x18] sm:$0xff] %vm756_vm5, %v715_v5 }
  0xe5   : > { %768 = vst.msk [vmem:[#allocation3 + $0x58] sm:$0xff] %vm756_vm5, %v731_v4  ;;  %720 = vrot.lane.b32.xlu0 %v2164_v43, %s2668_s14 }
  0xe6   : > { %736 = vrot.lane.b32.xlu1 %v980_v63, %s2668_s14 }
  0xe7   : > { %v810_v8 = vpop.permute.xlu0 %809 }
  0xe8   : > { %v826_v7 = vpop.permute.xlu1 %825  ;;  %856 = vst.msk [vmem:[#allocation3 + $0x10] sm:$0xff] %vm853_vm6, %v810_v8 }
  0xe9   : > { %864 = vst.msk [vmem:[#allocation3 + $0x50] sm:$0xff] %vm853_vm6, %v826_v7  ;;  %1010 = vrot.lane.b32.xlu0 %v2162_v42, %s2674_s13 }
  0xea   : > { %1026 = vrot.lane.b32.xlu1 %v981_v6, %s2674_s13 }
  0xeb   : > { %v1100_v11 = vpop.permute.xlu0 %1099 }
  0xec   : > { %v1116_v10 = vpop.permute.xlu1 %1115  ;;  %1147 = vst.msk [vmem:[#allocation3 + $0x8] sm:$0xff] %vm1145_vm9, %v1100_v11 }
  0xed   : > { %1155 = vst.msk [vmem:[#allocation3 + $0x48] sm:$0xff] %vm1145_vm9, %v1116_v10  ;;  %1105 = vrot.lane.b32.xlu0 %v2117_v25, %s2675_s17 }
  0xee   : > { %1121 = vrot.lane.b32.xlu1 %v1077_v9, %s2675_s17 }
  0xef   : > { %v1195_v12 = vpop.permute.xlu0 %1194 }
  0xf0   : > { %v1211_v43 = vpop.permute.xlu1 %1210  ;;  %1243 = vst.msk [vmem:[#allocation3] sm:$0xff] %vm1242_vm10, %v1195_v12 }
  0xf1   : > { %1251 = vst.msk [vmem:[#allocation3 + $0x40] sm:$0xff] %vm1242_vm10, %v1211_v43  ;;  %722 = vrot.lane.b32.xlu0 %v2162_v42, %s2668_s14 }
  0xf2   : > { %738 = vrot.lane.b32.xlu1 %v981_v6, %s2668_s14  ;;  %s332_s14 = sand.u32 1, %s1917_s19  }
  0xf3   : > { %v522_v14 = vpop.permute.xlu0 %521  ;;  %s2592_s21 = scalar_lea.sflag [#allocation5], %s332_s14 }
  0xf4   : > { %v538_v13 = vpop.permute.xlu1 %537  ;;  %566 = vst.msk [vmem:[#allocation3 + $0x20] sm:$0xff] %vm561_vm3, %v522_v14 }
  0xf5   : > { %574 = vst.msk [vmem:[#allocation3 + $0x60] sm:$0xff] %vm561_vm3, %v538_v13  ;;  %817 = vrot.lane.b32.xlu0 %v2117_v25, %s2669_s30  ;;  %v1174_v25 = vld [vmem:[#allocation2 + $0xc2] sm:$0xff] }
  0xf6   : > { %833 = vrot.lane.b32.xlu1 %v1077_v9, %s2669_s30 }
  0xf7   : > { %v812_v17 = vpop.permute.xlu0 %811  ;;  %v1259_v18 = vld [vmem:[#allocation3] sm:$0xff] }
  0xf8   : > { %v828_v16 = vpop.permute.xlu1 %827  ;;  %v1267_v19 = vld [vmem:[#allocation3 + $0x40] sm:$0xff]  ;;  %857 = vst.msk [vmem:[#allocation3 + $0x18] sm:$0xff] %vm853_vm6, %v812_v17  ;;  %1731 = vmatprep.mubr.msk.f32.mxu0 %vm1287_vm11, %v1259_v18 }
  0xf9   : > { %865 = vst.msk [vmem:[#allocation3 + $0x58] sm:$0xff] %vm853_vm6, %v828_v16  ;;  %1743 = vmatprep.mubr.msk.f32.mxu1 %vm1287_vm11, %v1267_v19  ;;  %1107 = vrot.lane.b32.xlu0 %v2115_v24, %s2675_s17 }
  0xfa   : > { %1123 = vrot.lane.b32.xlu1 %v1078_v15, %s2675_s17 }
  0xfb   : > { %v907_v20 = vpop.permute.xlu0 %906 }
  0xfc   : > { %v923_v42 = vpop.permute.xlu1 %922  ;;  %953 = vst.msk [vmem:[#allocation3 + $0x10] sm:$0xff] %vm950_vm7, %v907_v20 }
  0xfd   : > { %961 = vst.msk [vmem:[#allocation3 + $0x50] sm:$0xff] %vm950_vm7, %v923_v42  ;;  %1202 = vrot.lane.b32.xlu0 %v2133_v30, %s2671_s15 }
  0xfe   : > { %1218 = vrot.lane.b32.xlu1 %v1174_v25, %s2671_s15 }
  0xff   : > { %v1197_v22 = vpop.permute.xlu0 %1196 }
 0x100   : > { %v1213_v21 = vpop.permute.xlu1 %1212  ;;  %1244 = vst.msk [vmem:[#allocation3 + $0x8] sm:$0xff] %vm1242_vm10, %v1197_v22 }
 0x101   : > { %1252 = vst.msk [vmem:[#allocation3 + $0x48] sm:$0xff] %vm1242_vm10, %v1213_v21  ;;  %819 = vrot.lane.b32.xlu0 %v2115_v24, %s2669_s30 }
 0x102   : > { %835 = vrot.lane.b32.xlu1 %v1078_v15, %s2669_s30  ;;  %s1655_s30 = sshll.u32 %s332_s14, 7 }
 0x103   : > { %v524_v27 = vpop.permute.xlu0 %523  ;;  %s2546_s16 = scalar_lea.vmem [#allocation4], %s1655_s30 }
 0x104   : > { %v540_v23 = vpop.permute.xlu1 %539  ;;  %567 = vst.msk [vmem:[#allocation3 + $0x28] sm:$0xff] %vm561_vm3, %v524_v27 }
 0x105   : > { %575 = vst.msk [vmem:[#allocation3 + $0x68] sm:$0xff] %vm561_vm3, %v540_v23  ;;  %914 = vrot.lane.b32.xlu0 %v2133_v30, %s2670_s10 }
 0x106   : > { %930 = vrot.lane.b32.xlu1 %v1174_v25, %s2670_s10 }
 0x107   : > { %v619_v32 = vpop.permute.xlu0 %618  ;;  %v1260_v33 = vld [vmem:[#allocation3 + $0x8] sm:$0xff] }
 0x108   : > { %v635_v31 = vpop.permute.xlu1 %634  ;;  %v1268_v34 = vld [vmem:[#allocation3 + $0x48] sm:$0xff]  ;;  %663 = vst.msk [vmem:[#allocation3 + $0x20] sm:$0xff] %vm658_vm4, %v619_v32  ;;  %1732 = vmatmul.mubr.msk.f32.vlgmr.msra.gmra.mxu0 %vm1287_vm11, %v1260_v33 }
 0x109   : > { %671 = vst.msk [vmem:[#allocation3 + $0x60] sm:$0xff] %vm658_vm4, %v635_v31  ;;  %1744 = vmatmul.mubr.msk.f32.vlgmr.msra.gmra.mxu1 %vm1287_vm11, %v1268_v34  ;;  %1204 = vrot.lane.b32.xlu0 %v2154_v36, %s2671_s15 }
 0x10a   : > { %1220 = vrot.lane.b32.xlu1 %v1175_v29, %s2671_s15 }
 0x10b   : > { %v909_v30 = vpop.permute.xlu0 %908 }
 0x10c   : > { %v925_v24 = vpop.permute.xlu1 %924  ;;  %954 = vst.msk [vmem:[#allocation3 + $0x18] sm:$0xff] %vm950_vm7, %v909_v30 }
 0x10d   : > { %962 = vst.msk [vmem:[#allocation3 + $0x58] sm:$0xff] %vm950_vm7, %v925_v24  ;;  %916 = vrot.lane.b32.xlu0 %v2154_v36, %s2670_s10  ;;  %v1079_v36 = vld [vmem:[#allocation2 + $0xd9] sm:$0xff] }
 0x10e   : > { %932 = vrot.lane.b32.xlu1 %v1175_v29, %s2670_s10  ;;  %s1683_s10 = sshll.u32 %s1929_s22, 5 }
 0x10f   : > { %v1005_v38 = vpop.permute.xlu0 %1004 }
 0x110   : > { %v1021_v37 = vpop.permute.xlu1 %1020  ;;  %1051 = vst.msk [vmem:[#allocation3 + $0x10] sm:$0xff] %vm1048_vm8, %v1005_v38 }
 0x111   : > { %1059 = vst.msk [vmem:[#allocation3 + $0x50] sm:$0xff] %vm1048_vm8, %v1021_v37  ;;  %1012 = vrot.lane.b32.xlu0 %v2119_v26, %s2674_s13  ;;  %v1080_v26 = vld [vmem:[#allocation2 + $0xe1] sm:$0xff] }
 0x112   : > { %1028 = vrot.lane.b32.xlu1 %v982_v35, %s2674_s13 }
 0x113   : > { %v621_v41 = vpop.permute.xlu0 %620 }
 0x114   : > { %v637_v40 = vpop.permute.xlu1 %636  ;;  %664 = vst.msk [vmem:[#allocation3 + $0x28] sm:$0xff] %vm658_vm4, %v621_v41 }
 0x115   : > { %672 = vst.msk [vmem:[#allocation3 + $0x68] sm:$0xff] %vm658_vm4, %v637_v40  ;;  %1014 = vrot.lane.b32.xlu0 %v2121_v28, %s2674_s13  ;;  %v1176_v28 = vld [vmem:[#allocation2 + $0xda] sm:$0xff] }
 0x116   : > { %1030 = vrot.lane.b32.xlu1 %v983_v39, %s2674_s13  ;;  %s1519_s13 = sshll.u32 %s2546_s16, 4  ;;  %s2584_s13 = int_to_ptr.vmem [resolvable:$true] %s1519_s13 }
 0x117   : > { %v717_v45 = vpop.permute.xlu0 %716  ;;  %s1849_s22 = scalar_lea.vmem %s2584_s13, 2048 }
 0x118   : > { %v733_v44 = vpop.permute.xlu1 %732  ;;  %761 = vst.msk [vmem:[#allocation3 + $0x20] sm:$0xff] %vm756_vm5, %v717_v45  ;;  %p1850_p2 = scmp.ne.s32.totalorder %s2584_s13, %s1849_s22 }
 0x119   : > { %769 = vst.msk [vmem:[#allocation3 + $0x60] sm:$0xff] %vm756_vm5, %v733_v44  ;;  %1109 = vrot.lane.b32.xlu0 %v2195_v48, %s2675_s17  ;;  %v1177_v48 = vld [vmem:[#allocation2 + $0xe2] sm:$0xff] }
 0x11a   : > { %1125 = vrot.lane.b32.xlu1 %v1079_v36, %s2675_s17  ;;  %p1851_p4 = pnand %p1850_p2, %p2034_p3 }
 0x11b   : > { %v1007_v47 = vpop.permute.xlu0 %1006 }
 0x11c   : > { %v1023_v46 = vpop.permute.xlu1 %1022  ;;  %1052 = vst.msk [vmem:[#allocation3 + $0x18] sm:$0xff] %vm1048_vm8, %v1007_v47  ;;  %p1852_p5 = pneg %p1851_p4 }
 0x11d   : > { %1060 = vst.msk [vmem:[#allocation3 + $0x58] sm:$0xff] %vm1048_vm8, %v1023_v46  ;;  %1111 = vrot.lane.b32.xlu0 %v2203_v50, %s2675_s17 }
 0x11e   : > { %1127 = vrot.lane.b32.xlu1 %v1080_v26, %s2675_s17 }
 0x11f   : > { %v1102_v51 = vpop.permute.xlu0 %1101 }
 0x120   : > { %v1118_v49 = vpop.permute.xlu1 %1117  ;;  %1148 = vst.msk [vmem:[#allocation3 + $0x10] sm:$0xff] %vm1145_vm9, %v1102_v51 }
 0x121   : > { %1156 = vst.msk [vmem:[#allocation3 + $0x50] sm:$0xff] %vm1145_vm9, %v1118_v49  ;;  %1206 = vrot.lane.b32.xlu0 %v2208_v52, %s2671_s15 }
 0x122   : > { %1222 = vrot.lane.b32.xlu1 %v1176_v28, %s2671_s15 }
 0x123   : > { %v719_v54 = vpop.permute.xlu0 %718 }
 0x124   : > { %v735_v53 = vpop.permute.xlu1 %734  ;;  %762 = vst.msk [vmem:[#allocation3 + $0x28] sm:$0xff] %vm756_vm5, %v719_v54 }
 0x125   : > { %770 = vst.msk [vmem:[#allocation3 + $0x68] sm:$0xff] %vm756_vm5, %v735_v53  ;;  %1208 = vrot.lane.b32.xlu0 %v2229_v55, %s2671_s15 }
 0x126   : > { %1224 = vrot.lane.b32.xlu1 %v1177_v48, %s2671_s15  ;;  %s1516_s15 = sadd.s32 %s1699_s26, %s1683_s10  ;;  %s1853_s26 = sshll.u32 %s1951_s12, 4  ;;  %s1854_s26 = int_to_ptr.vmem [resolvable:$false] %s1853_s26 }
 0x127   : > { %v814_v56 = vpop.permute.xlu0 %813  ;;  %s1684_s9 = sshll.u32 %s1516_s15, 7  ;;  %s1855_s10 = scalar_lea.vmem %s1854_s26, 4096 }
 0x128   : > { %v830_v50 = vpop.permute.xlu1 %829  ;;  %858 = vst.msk [vmem:[#allocation3 + $0x20] sm:$0xff] %vm853_vm6, %v814_v56  ;;  %s2578_s8 = scalar_lea.hbm %s2649_s5, %s1684_s9  ;;  %p1856_p6 = scmp.lt.s32.totalorder %s2584_s13, %s1854_s26 }
 0x129   : > { %866 = vst.msk [vmem:[#allocation3 + $0x60] sm:$0xff] %vm853_vm6, %v830_v50  ;;  %p1857_p7 = scmp.lt.s32.totalorder %s1855_s10, %s1849_s22 }
 0x12b   : > { %v1104_v52 = vpop.permute.xlu0 %1103  ;;  %p1858_p9 = por %p1857_p7, %p1856_p6 }
 0x12c   : > { %v1120_v57 = vpop.permute.xlu1 %1119  ;;  %1149 = vst.msk [vmem:[#allocation3 + $0x18] sm:$0xff] %vm1145_vm9, %v1104_v52 }
 0x12d   : > { %1157 = vst.msk [vmem:[#allocation3 + $0x58] sm:$0xff] %vm1145_vm9, %v1120_v57  ;;  %p1859_p10 = pnand %p1858_p9, %p1852_p5 }
 0x12f   : > { %v1199_v59 = vpop.permute.xlu0 %1198 }
 0x130   : > { %v1215_v58 = vpop.permute.xlu1 %1214  ;;  %1245 = vst.msk [vmem:[#allocation3 + $0x10] sm:$0xff] %vm1242_vm10, %v1199_v59 }
 0x131   : > { %1253 = vst.msk [vmem:[#allocation3 + $0x50] sm:$0xff] %vm1242_vm10, %v1215_v58 }
 0x133   : > { %v526_v55 = vpop.permute.xlu0 %525 }
 0x134   : > { %v542_v60 = vpop.permute.xlu1 %541  ;;  %568 = vst.msk [vmem:[#allocation3 + $0x30] sm:$0xff] %vm561_vm3, %v526_v55 }
 0x135   : > { %576 = vst.msk [vmem:[#allocation3 + $0x70] sm:$0xff] %vm561_vm3, %v542_v60  ;;  %v1662_v60 = vld [vmem:[%s2648_s4] ss:$0 sm:$0xff] }
 0x137   : > { %v816_v62 = vpop.permute.xlu0 %815  ;;  %v1261_v63 = vld [vmem:[#allocation3 + $0x10] sm:$0xff] }
 0x138   : > { %v832_v61 = vpop.permute.xlu1 %831  ;;  %v1269_v0 = vld [vmem:[#allocation3 + $0x50] sm:$0xff]  ;;  %859 = vst.msk [vmem:[#allocation3 + $0x28] sm:$0xff] %vm853_vm6, %v816_v62  ;;  %1734 = vmatprep.mubr.msk.f32.mxu0 %vm1287_vm11, %v1261_v63 }
 0x139   : > { %867 = vst.msk [vmem:[#allocation3 + $0x68] sm:$0xff] %vm853_vm6, %v832_v61  ;;  %1746 = vmatprep.mubr.msk.f32.mxu1 %vm1287_vm11, %v1269_v0 }
 0x13b   : > { %v911_v2 = vpop.permute.xlu0 %910 }
 0x13c   : > { %v927_v1 = vpop.permute.xlu1 %926  ;;  %955 = vst.msk [vmem:[#allocation3 + $0x20] sm:$0xff] %vm950_vm7, %v911_v2 }
 0x13d   : > { %963 = vst.msk [vmem:[#allocation3 + $0x60] sm:$0xff] %vm950_vm7, %v927_v1 }
 0x13f   : > { %v1201_v4 = vpop.permute.xlu0 %1200 }
 0x140   : > { %v1217_v3 = vpop.permute.xlu1 %1216  ;;  %1246 = vst.msk [vmem:[#allocation3 + $0x18] sm:$0xff] %vm1242_vm10, %v1201_v4 }
 0x141   : > { %1254 = vst.msk [vmem:[#allocation3 + $0x58] sm:$0xff] %vm1242_vm10, %v1217_v3 }
 0x143   : > { %v528_v6 = vpop.permute.xlu0 %527 }
 0x144   : > { %v544_v5 = vpop.permute.xlu1 %543  ;;  %569 = vst.msk [vmem:[#allocation3 + $0x38] sm:$0xff] %vm561_vm3, %v528_v6 }
 0x145   : > { %577 = vst.msk [vmem:[#allocation3 + $0x78] sm:$0xff] %vm561_vm3, %v544_v5 }
 0x147   : > { %v623_v8 = vpop.permute.xlu0 %622  ;;  %v1262_v9 = vld [vmem:[#allocation3 + $0x18] sm:$0xff] }
 0x148   : > { %v639_v7 = vpop.permute.xlu1 %638  ;;  %v1270_v10 = vld [vmem:[#allocation3 + $0x58] sm:$0xff]  ;;  %665 = vst.msk [vmem:[#allocation3 + $0x30] sm:$0xff] %vm658_vm4, %v623_v8  ;;  %1735 = vmatmul.mubr.msk.f32.gmra.mxu0 %vm1287_vm11, %v1262_v9 }
 0x149   : > { %673 = vst.msk [vmem:[#allocation3 + $0x70] sm:$0xff] %vm658_vm4, %v639_v7  ;;  %1747 = vmatmul.mubr.msk.f32.gmra.mxu1 %vm1287_vm11, %v1270_v10 }
 0x14b   : > { %v913_v43 = vpop.permute.xlu0 %912 }
 0x14c   : > { %v929_v11 = vpop.permute.xlu1 %928  ;;  %956 = vst.msk [vmem:[#allocation3 + $0x28] sm:$0xff] %vm950_vm7, %v913_v43 }
 0x14d   : > { %964 = vst.msk [vmem:[#allocation3 + $0x68] sm:$0xff] %vm950_vm7, %v929_v11 }
 0x14f   : > { %v1009_v13 = vpop.permute.xlu0 %1008 }
 0x150   : > { %v1025_v12 = vpop.permute.xlu1 %1024  ;;  %1053 = vst.msk [vmem:[#allocation3 + $0x20] sm:$0xff] %vm1048_vm8, %v1009_v13 }
 0x151   : > { %1061 = vst.msk [vmem:[#allocation3 + $0x60] sm:$0xff] %vm1048_vm8, %v1025_v12 }
 0x153   : > { %v625_v15 = vpop.permute.xlu0 %624 }
 0x154   : > { %v641_v14 = vpop.permute.xlu1 %640  ;;  %666 = vst.msk [vmem:[#allocation3 + $0x38] sm:$0xff] %vm658_vm4, %v625_v15 }
 0x155   : > { %674 = vst.msk [vmem:[#allocation3 + $0x78] sm:$0xff] %vm658_vm4, %v641_v14 }
 0x157   : > { %v721_v17 = vpop.permute.xlu0 %720 }
 0x158   : > { %v737_v16 = vpop.permute.xlu1 %736  ;;  %763 = vst.msk [vmem:[#allocation3 + $0x30] sm:$0xff] %vm756_vm5, %v721_v17 }
 0x159   : > { %771 = vst.msk [vmem:[#allocation3 + $0x70] sm:$0xff] %vm756_vm5, %v737_v16 }
 0x15b   : > { %v1011_v19 = vpop.permute.xlu0 %1010 }
 0x15c   : > { %v1027_v18 = vpop.permute.xlu1 %1026  ;;  %1054 = vst.msk [vmem:[#allocation3 + $0x28] sm:$0xff] %vm1048_vm8, %v1011_v19 }
 0x15d   : > { %1062 = vst.msk [vmem:[#allocation3 + $0x68] sm:$0xff] %vm1048_vm8, %v1027_v18 }
 0x15f   : > { %v1106_v42 = vpop.permute.xlu0 %1105 }
 0x160   : > { %v1122_v25 = vpop.permute.xlu1 %1121  ;;  %1150 = vst.msk [vmem:[#allocation3 + $0x20] sm:$0xff] %vm1145_vm9, %v1106_v42 }
 0x161   : > { %1158 = vst.msk [vmem:[#allocation3 + $0x60] sm:$0xff] %vm1145_vm9, %v1122_v25 }
 0x163   : > { %v723_v21 = vpop.permute.xlu0 %722 }
 0x164   : > { %v739_v20 = vpop.permute.xlu1 %738  ;;  %764 = vst.msk [vmem:[#allocation3 + $0x38] sm:$0xff] %vm756_vm5, %v723_v21 }
 0x165   : > { %772 = vst.msk [vmem:[#allocation3 + $0x78] sm:$0xff] %vm756_vm5, %v739_v20 }
 0x167   : > { %v818_v23 = vpop.permute.xlu0 %817 }
 0x168   : > { %v834_v22 = vpop.permute.xlu1 %833  ;;  %860 = vst.msk [vmem:[#allocation3 + $0x30] sm:$0xff] %vm853_vm6, %v818_v23 }
 0x169   : > { %868 = vst.msk [vmem:[#allocation3 + $0x70] sm:$0xff] %vm853_vm6, %v834_v22 }
 0x16b   : > { %v1108_v29 = vpop.permute.xlu0 %1107 }
 0x16c   : > { %v1124_v27 = vpop.permute.xlu1 %1123  ;;  %1151 = vst.msk [vmem:[#allocation3 + $0x28] sm:$0xff] %vm1145_vm9, %v1108_v29 }
 0x16d   : > { %1159 = vst.msk [vmem:[#allocation3 + $0x68] sm:$0xff] %vm1145_vm9, %v1124_v27 }
 0x16f   : > { %v1203_v32 = vpop.permute.xlu0 %1202 }
 0x170   : > { %v1219_v31 = vpop.permute.xlu1 %1218  ;;  %1247 = vst.msk [vmem:[#allocation3 + $0x20] sm:$0xff] %vm1242_vm10, %v1203_v32 }
 0x171   : > { %1255 = vst.msk [vmem:[#allocation3 + $0x60] sm:$0xff] %vm1242_vm10, %v1219_v31 }
 0x173   : > { %v820_v34 = vpop.permute.xlu0 %819 }
 0x174   : > { %v836_v33 = vpop.permute.xlu1 %835  ;;  %861 = vst.msk [vmem:[#allocation3 + $0x38] sm:$0xff] %vm853_vm6, %v820_v34 }
 0x175   : > { %869 = vst.msk [vmem:[#allocation3 + $0x78] sm:$0xff] %vm853_vm6, %v836_v33 }
 0x177   : > { %v915_v30 = vpop.permute.xlu0 %914  ;;  %v1263_v35 = vld [vmem:[#allocation3 + $0x20] sm:$0xff] }
 0x178   : > { %v931_v24 = vpop.permute.xlu1 %930  ;;  %v1271_v37 = vld [vmem:[#allocation3 + $0x60] sm:$0xff]  ;;  %957 = vst.msk [vmem:[#allocation3 + $0x30] sm:$0xff] %vm950_vm7, %v915_v30  ;;  %1737 = vmatprep.mubr.msk.f32.mxu0 %vm1287_vm11, %v1263_v35 }
 0x179   : > { %965 = vst.msk [vmem:[#allocation3 + $0x70] sm:$0xff] %vm950_vm7, %v931_v24  ;;  %1749 = vmatprep.mubr.msk.f32.mxu1 %vm1287_vm11, %v1271_v37 }
 0x17b   : > { %v1205_v39 = vpop.permute.xlu0 %1204 }
 0x17c   : > { %v1221_v38 = vpop.permute.xlu1 %1220  ;;  %1248 = vst.msk [vmem:[#allocation3 + $0x28] sm:$0xff] %vm1242_vm10, %v1205_v39 }
 0x17d   : > { %1256 = vst.msk [vmem:[#allocation3 + $0x68] sm:$0xff] %vm1242_vm10, %v1221_v38 }
 0x17f   : > { %v917_v41 = vpop.permute.xlu0 %916 }
 0x180   : > { %v933_v40 = vpop.permute.xlu1 %932  ;;  %958 = vst.msk [vmem:[#allocation3 + $0x38] sm:$0xff] %vm950_vm7, %v917_v41 }
 0x181   : > { %966 = vst.msk [vmem:[#allocation3 + $0x78] sm:$0xff] %vm950_vm7, %v933_v40 }
 0x183   : > { %v1013_v44 = vpop.permute.xlu0 %1012  ;;  %v1264_v45 = vld [vmem:[#allocation3 + $0x28] sm:$0xff] }
 0x184   : > { %v1029_v36 = vpop.permute.xlu1 %1028  ;;  %v1272_v26 = vld [vmem:[#allocation3 + $0x68] sm:$0xff]  ;;  %1055 = vst.msk [vmem:[#allocation3 + $0x30] sm:$0xff] %vm1048_vm8, %v1013_v44  ;;  %1738 = vmatmul.mubr.msk.f32.gmra.mxu0 %vm1287_vm11, %v1264_v45 }
 0x185   : > { %1063 = vst.msk [vmem:[#allocation3 + $0x70] sm:$0xff] %vm1048_vm8, %v1029_v36  ;;  %1750 = vmatmul.mubr.msk.f32.gmra.mxu1 %vm1287_vm11, %v1272_v26 }
 0x187   : > { %v1015_v47 = vpop.permute.xlu0 %1014 }
 0x188   : > { %v1031_v46 = vpop.permute.xlu1 %1030  ;;  %1056 = vst.msk [vmem:[#allocation3 + $0x38] sm:$0xff] %vm1048_vm8, %v1015_v47 }
 0x189   : > { %1064 = vst.msk [vmem:[#allocation3 + $0x78] sm:$0xff] %vm1048_vm8, %v1031_v46 }
 0x18b   : > { %v1110_v49 = vpop.permute.xlu0 %1109 }
 0x18c   : > { %v1126_v28 = vpop.permute.xlu1 %1125  ;;  %1152 = vst.msk [vmem:[#allocation3 + $0x30] sm:$0xff] %vm1145_vm9, %v1110_v49 }
 0x18d   : > { %1160 = vst.msk [vmem:[#allocation3 + $0x70] sm:$0xff] %vm1145_vm9, %v1126_v28 }
 0x18f   : > { %v1112_v48 = vpop.permute.xlu0 %1111 }
 0x190   : > { %v1128_v51 = vpop.permute.xlu1 %1127  ;;  %1153 = vst.msk [vmem:[#allocation3 + $0x38] sm:$0xff] %vm1145_vm9, %v1112_v48 }
 0x191   : > { %1161 = vst.msk [vmem:[#allocation3 + $0x78] sm:$0xff] %vm1145_vm9, %v1128_v51 }
 0x193   : > { %v1207_v54 = vpop.permute.xlu0 %1206 }
 0x194   : > { %v1223_v53 = vpop.permute.xlu1 %1222  ;;  %1249 = vst.msk [vmem:[#allocation3 + $0x30] sm:$0xff] %vm1242_vm10, %v1207_v54 }
 0x195   : > { %1257 = vst.msk [vmem:[#allocation3 + $0x70] sm:$0xff] %vm1242_vm10, %v1223_v53 }
 0x197   : > { %v1209_v56 = vpop.permute.xlu0 %1208 }
 0x198   : > { %v1225_v50 = vpop.permute.xlu1 %1224  ;;  %1250 = vst.msk [vmem:[#allocation3 + $0x38] sm:$0xff] %vm1242_vm10, %v1209_v56 }
 0x199   : > { %1258 = vst.msk [vmem:[#allocation3 + $0x78] sm:$0xff] %vm1242_vm10, %v1225_v50 }
 0x19b   : > { %v1265_v57 = vld [vmem:[#allocation3 + $0x30] sm:$0xff] }
 0x19c   : > { %v1273_v52 = vld [vmem:[#allocation3 + $0x70] sm:$0xff]  ;;  %1740 = vmatprep.mubr.msk.f32.mxu0 %vm1287_vm11, %v1265_v57 }
 0x19d   : > { %1752 = vmatprep.mubr.msk.f32.mxu1 %vm1287_vm11, %v1273_v52 }
 0x19f   : > { %v1266_v58 = vld [vmem:[#allocation3 + $0x38] sm:$0xff] }
 0x1a0   : > { %v1274_v59 = vld [vmem:[#allocation3 + $0x78] sm:$0xff]  ;;  %1741 = vmatmul.mubr.msk.f32.gmra.mxu0 %vm1287_vm11, %v1266_v58 }
 0x1a1   : > { %1753 = vmatmul.mubr.msk.f32.gmra.mxu1 %vm1287_vm11, %v1274_v59 }
 0x1c8   : > { %v1733_v55 = vpop.f32.mrf.mxu0 }
 0x1c9   : > { %v1745_v61 = vpop.f32.mrf.mxu1  ;;  %v1412_v62 = vadd.f32 %v1733_v55, %v1662_v60 }
 0x1ca   : > { %v1452_v63 = vadd.f32 %v1745_v61, %v1662_v60  ;;  %v1406_v0 = vpop.f32.mrf.mxu0 }
 0x1cb   : > { %v1446_v1 = vpop.f32.mrf.mxu1  ;;  %1487 = vst.msk [vmem:[%s2546_s16 + $0x8] sm:$0xff] %vm1485_vm12, %v1412_v62  ;;  %v1407_v2 = vadd.f32 %v1662_v60, %v1406_v0 }
 0x1cc   : > { %1495 = vst.msk [vmem:[%s2546_s16 + $0x48] sm:$0xff] %vm1485_vm12, %v1452_v63  ;;  %v1447_v3 = vadd.f32 %v1662_v60, %v1446_v1 }
 0x1cd   : > { %1486 = vst.msk [vmem:[%s2546_s16] sm:$0xff] %vm1485_vm12, %v1407_v2 }
 0x1ce   : > { %1494 = vst.msk [vmem:[%s2546_s16 + $0x40] sm:$0xff] %vm1485_vm12, %v1447_v3 }
 0x208   : > { %v1736_v4 = vpop.f32.mrf.mxu0 }
 0x209   : > { %v1748_v5 = vpop.f32.mrf.mxu1  ;;  %v1422_v6 = vadd.f32 %v1736_v4, %v1662_v60 }
 0x20a   : > { %v1462_v7 = vadd.f32 %v1748_v5, %v1662_v60  ;;  %v1416_v8 = vpop.f32.mrf.mxu0 }
 0x20b   : > { %v1456_v9 = vpop.f32.mrf.mxu1  ;;  %1489 = vst.msk [vmem:[%s2546_s16 + $0x18] sm:$0xff] %vm1485_vm12, %v1422_v6  ;;  %v1417_v10 = vadd.f32 %v1662_v60, %v1416_v8 }
 0x20c   : > { %1497 = vst.msk [vmem:[%s2546_s16 + $0x58] sm:$0xff] %vm1485_vm12, %v1462_v7  ;;  %v1457_v11 = vadd.f32 %v1662_v60, %v1456_v9 }
 0x20d   : > { %1488 = vst.msk [vmem:[%s2546_s16 + $0x10] sm:$0xff] %vm1485_vm12, %v1417_v10 }
 0x20e   : > { %1496 = vst.msk [vmem:[%s2546_s16 + $0x50] sm:$0xff] %vm1485_vm12, %v1457_v11 }
 0x244   : > { %v1739_v43 = vpop.f32.mrf.mxu0 }
 0x245   : > { %v1751_v12 = vpop.f32.mrf.mxu1  ;;  %v1432_v13 = vadd.f32 %v1739_v43, %v1662_v60 }
 0x246   : > { %v1472_v14 = vadd.f32 %v1751_v12, %v1662_v60  ;;  %v1426_v15 = vpop.f32.mrf.mxu0 }
 0x247   : > { %v1466_v16 = vpop.f32.mrf.mxu1  ;;  %1491 = vst.msk [vmem:[%s2546_s16 + $0x28] sm:$0xff] %vm1485_vm12, %v1432_v13  ;;  %v1427_v17 = vadd.f32 %v1662_v60, %v1426_v15 }
 0x248   : > { %1499 = vst.msk [vmem:[%s2546_s16 + $0x68] sm:$0xff] %vm1485_vm12, %v1472_v14  ;;  %v1467_v18 = vadd.f32 %v1662_v60, %v1466_v16 }
 0x249   : > { %1490 = vst.msk [vmem:[%s2546_s16 + $0x20] sm:$0xff] %vm1485_vm12, %v1427_v17 }
 0x24a   : > { %1498 = vst.msk [vmem:[%s2546_s16 + $0x60] sm:$0xff] %vm1485_vm12, %v1467_v18 }
 0x260   : > { %v1742_v19 = vpop.f32.mrf.mxu0 }
 0x261   : > { %v1754_v25 = vpop.f32.mrf.mxu1  ;;  %v1442_v42 = vadd.f32 %v1742_v19, %v1662_v60 }
 0x262   : > { %v1482_v20 = vadd.f32 %v1754_v25, %v1662_v60  ;;  %v1436_v21 = vpop.f32.mrf.mxu0 }
 0x263   : > { %v1476_v22 = vpop.f32.mrf.mxu1  ;;  %1493 = vst.msk [vmem:[%s2546_s16 + $0x38] sm:$0xff] %vm1485_vm12, %v1442_v42  ;;  %v1437_v23 = vadd.f32 %v1662_v60, %v1436_v21 }
 0x264   : > { %1501 = vst.msk [vmem:[%s2546_s16 + $0x78] sm:$0xff] %vm1485_vm12, %v1482_v20  ;;  %v1477_v27 = vadd.f32 %v1662_v60, %v1476_v22 }
 0x265   : > { %1492 = vst.msk [vmem:[%s2546_s16 + $0x30] sm:$0xff] %vm1485_vm12, %v1437_v23 }
 0x266   : > { %1500 = vst.msk [vmem:[%s2546_s16 + $0x70] sm:$0xff] %vm1485_vm12, %v1477_v27 }
 0x267   : > { %1862 = shalt.err (!%p1859_p10)
}
 0x268   : > { %s1863_s14 = scalar_lea.hbm %s2578_s8, 2048  ;;  %s1867_s9 = scalar_lea.hbm %s2649_s5, 8192 }
 0x269   : > { %p1864_p11 = scmp.ne.s32.totalorder %s2578_s8, %s1863_s14  ;;  %p1868_p0 = scmp.lt.s32.totalorder %s2578_s8, %s2649_s5 }
 0x26a   : > { %p1869_p1 = scmp.lt.s32.totalorder %s1867_s9, %s1863_s14 }
 0x26b   : > { %p1865_p12 = pnand %p1864_p11, %p2034_p3 }
 0x26c   : > { %p1870_p2 = por %p1869_p1, %p1868_p0 }
 0x26d   : > { %p1866_p13 = pneg %p1865_p12 }
 0x26f   : > { %p1871_p4 = pnand %p1870_p2, %p1866_p13 }
 0x271   : > { %1874 = shalt.err (!%p1871_p4)
}
 0x272   : > { %s1952_s22 = smov 128  }
 0x273   : > { %1769 = dma.vmem_to_hbm [thread:$0]  (%p2034_p3), %s2584_s13, 2048, %s2578_s8, %s2592_s21, %s1952_s22, %s1952_s22, %s2673_s27  }
 0x274 PF: > { %p1775_p5 = scmp.ge.s32.totalorder %s1941_s25, 2  ;;  %s1534_s12 = sand.u32 1, %s1913_s18  }
 0x275   : > { %s1535_s26 = scalar_lea.sflag [#allocation5], %s1534_s12 }
 0x276   : > { %p1772_p6 = pnand %p1775_p5, %p2043_p8 }
 0x278   : > { %p1773_p7 = pneg %p1772_p6 }
 0x27a   : > { %1908 = dma.done.wait (%p1773_p7), %s1535_s26, 2048  }
 0x27b   : > { %1910 = vsyncadd (%p1773_p7), %s1535_s26, 4294965248  ;;  %s18_s25 = sadd.s32 1, %s1941_s25   ;;  %s2676_s18 = smov %s1917_s19 }
 0x27c   : > { %p15_p9 = scmp.ge.s32.totalorder %s18_s25, 6   ;;  %s2677_s19 = smov %s1921_s20 }
 0x27d   : > { %s2678_s20 = smov %s2052_s11  ;;  %s2679_s21 = smov %s1933_s23 }
 0x27e   : > { %s2680_s22 = smov %s1937_s24  ;;  %s2681_s23 = smov %s2684_s28 }
 0x27f   : > { %s2682_s24 = smov %s2688_s29  ;;  %17 = sbr.rel (!%p15_p9) target bundleno = 5 (0x5), region = 85 }
 0x284   :  { %1540 = vsyncpa [#allocation5], 1 }
 0x285   :  { %1542 = vsyncpa [#allocation5 + $0x1], 1 }

</bundles_post_ra>
